<compile_context>
chip_gen: v6e
topology: v6e:2x2x1
jax: 0.10.0
libtpu: 0.0.40
codegen_flags: <defaults>
</compile_context>

<pallas_src>
import functools
import math

import jax
import jax.numpy as jnp
import numpy as np
from jax.experimental import pallas as pl
from jax.experimental.pallas import tpu as pltpu


def _sigmoid(x):
    # sigmoid(x) == 0.5 * (1 + tanh(x/2)): one EUP transcendental instead of two.
    return 0.5 * (1.0 + jnp.tanh(0.5 * x))


# -----------------------------------------------------------------------------
# Fused bidirectional LSTM recurrence kernel.
# Grid = (n_tb,): sequential time blocks; both directions are interleaved in each
# unrolled step (forward walks block tb, backward walks block n_tb-1-tb in reverse).
# -----------------------------------------------------------------------------
def _bilstm_kernel(gxf_ref, gxb_ref, whh_ref, b_ref, len_ref,
                   of_ref, ob_ref, h_sc, c_sc, *, hidden, tc, n_tb):
    """gxf_ref/gxb_ref: (tc, B, 4H) f32  precomputed x @ W_ih for this time block
                        (forward block tb / backward block n_tb-1-tb)
       whh_ref: (2, H, 4H) bf16          recurrent weights (0 = fwd, 1 = bwd), resident
       b_ref  : (2, 4H) f32              b_ih + b_hh per direction, resident
       len_ref: (B, 1) int32             sequence lengths, resident
       of_ref/ob_ref: (tc, B, H) f32     hidden states (zeros at padded positions)
       h_sc/c_sc: (2, B, H) f32          carried LSTM state, persists across blocks"""
    H = hidden
    tb = pl.program_id(0)

    @pl.when(tb == 0)
    def _():
        h_sc[...] = jnp.zeros_like(h_sc)
        c_sc[...] = jnp.zeros_like(c_sc)

    whh_f = whh_ref[0]                      # (H, 4H) bf16
    whh_b = whh_ref[1]
    bias = b_ref[...]                       # (2, 4H) f32
    b_f = bias[0:1, :]                      # (1, 4H): broadcasts over batch sublanes
    b_b = bias[1:2, :]

    B = len_ref.shape[0]
    # Hoisted once per grid step: (B,1) -> (B,H) broadcast of the lengths, so the
    # per-step validity check is a single scalar compare with no broadcast_in_dim.
    lens_bh = jnp.broadcast_to(len_ref[...], (B, H))

    blk0_f = tb * tc                        # global t of element 0 of the fwd block
    blk0_b = (n_tb - 1 - tb) * tc           # global t of element 0 of the bwd block

    h_f = h_sc[0]
    c_f = c_sc[0]
    h_b = h_sc[1]
    c_b = c_sc[1]

    def lstm_cell(gates, c_prev):
        # PyTorch gate order: i, f, g, o.  (For H % 128 == 0 these slices are
        # vreg-aligned; for small H the compiler resolves the lane offsets.)
        i_g = _sigmoid(gates[:, 0 * H:1 * H])
        f_g = _sigmoid(gates[:, 1 * H:2 * H])
        g_g = jnp.tanh(gates[:, 2 * H:3 * H])
        o_g = _sigmoid(gates[:, 3 * H:4 * H])
        c_new = f_g * c_prev + i_g * g_g
        h_new = o_g * jnp.tanh(c_new)
        return h_new, c_new

    for s in range(tc):                     # fully unrolled
        sb = tc - 1 - s                     # backward walks its block in reverse
        # Two independent dependency chains per step -> the scheduler interleaves
        # their MXU pushes, EUP transcendentals and VPU work.
        gates_f = gxf_ref[s] + b_f + jnp.dot(
            h_f.astype(jnp.bfloat16), whh_f, preferred_element_type=jnp.float32)
        gates_b = gxb_ref[sb] + b_b + jnp.dot(
            h_b.astype(jnp.bfloat16), whh_b, preferred_element_type=jnp.float32)
        hf_new, cf_new = lstm_cell(gates_f, c_f)
        hb_new, cb_new = lstm_cell(gates_b, c_b)

        vf = lens_bh > (blk0_f + s)         # (B, H) bool
        vb = lens_bh > (blk0_b + sb)
        h_f = jnp.where(vf, hf_new, h_f)    # freeze state on padding
        c_f = jnp.where(vf, cf_new, c_f)
        h_b = jnp.where(vb, hb_new, h_b)
        c_b = jnp.where(vb, cb_new, c_b)
        of_ref[s] = jnp.where(vf, hf_new, 0.0)    # pad_packed pads with zeros
        ob_ref[sb] = jnp.where(vb, hb_new, 0.0)

    h_sc[0] = h_f
    c_sc[0] = c_f
    h_sc[1] = h_b
    c_sc[1] = c_b


def _bilstm_recurrence(gx_f, gx_b, whh_bf16, bias, lens_b1, *, hidden, tc):
    """gx_f/gx_b: (T_pad, B, 4H) f32, whh_bf16: (2, H, 4H) bf16, bias: (2, 4H) f32,
    lens_b1: (B, 1) int32 -> (fwd, bwd) hidden states, each (T_pad, B, H) f32."""
    T_pad, B, G = gx_f.shape
    H = hidden
    n_tb = T_pad // tc
    kernel = functools.partial(_bilstm_kernel, hidden=H, tc=tc, n_tb=n_tb)

    # VMEM budget: double-buffered gx/out tiles + resident weights + state scratch.
    needed = (2 * 2 * tc * B * G * 4          # gx_f, gx_b tiles (f32, double-buffered)
              + 2 * 2 * tc * B * H * 4        # o_f, o_b tiles
              + 2 * 2 * H * G * 2             # W_hh (bf16)
              + 2 * 2 * G * 4 + 2 * B * 4     # bias + lengths
              + 2 * 2 * B * H * 4)            # h/c scratch
    try:
        vmem_cap = int(pltpu.get_tpu_info().vmem_capacity_bytes)
    except Exception:
        vmem_cap = 64 * 1024 * 1024           # assume v7x per-core (most restrictive)
    vmem_limit = min(max(32 << 20, int(1.5 * needed) + (8 << 20)), (vmem_cap * 3) // 4)

    grid_spec = pltpu.PrefetchScalarGridSpec(
        num_scalar_prefetch=0,
        grid=(n_tb,),
        in_specs=[
            pl.BlockSpec((tc, B, G), lambda tb: (tb, 0, 0)),              # gx fwd block
            pl.BlockSpec((tc, B, G), lambda tb: (n_tb - 1 - tb, 0, 0)),   # gx bwd block
            pl.BlockSpec((2, H, G), lambda tb: (0, 0, 0)),                # W_hh (resident)
            pl.BlockSpec((2, G), lambda tb: (0, 0)),                      # bias (resident)
            pl.BlockSpec((B, 1), lambda tb: (0, 0)),                      # lengths (resident)
        ],
        out_specs=[
            pl.BlockSpec((tc, B, H), lambda tb: (tb, 0, 0)),              # fwd hidden
            pl.BlockSpec((tc, B, H), lambda tb: (n_tb - 1 - tb, 0, 0)),   # bwd hidden
        ],
        scratch_shapes=[
            pltpu.VMEM((2, B, H), jnp.float32),                           # h state (fwd, bwd)
            pltpu.VMEM((2, B, H), jnp.float32),                           # c state (fwd, bwd)
        ],
    )
    return pl.pallas_call(
        kernel,
        out_shape=(jax.ShapeDtypeStruct((T_pad, B, H), jnp.float32),
                   jax.ShapeDtypeStruct((T_pad, B, H), jnp.float32)),
        grid_spec=grid_spec,
        compiler_params=pltpu.CompilerParams(
            dimension_semantics=("arbitrary",),   # sequential recurrence over time blocks
            vmem_limit_bytes=vmem_limit,
        ),
    )(gx_f, gx_b, whh_bf16, bias, lens_b1)


# -----------------------------------------------------------------------------
# Wrapper: full RNNEncoder forward (multi-layer, bidirectional).
# -----------------------------------------------------------------------------
def rnn_encoder_forward(x_btd, lengths, params, *, time_chunk=32):
    """x_btd: (B, T, input_size) f32, lengths: (B,) int.
    params: list over layers of (w_ih (2, D_in, 4H), w_hh (2, H, 4H), b (2, 4H)),
    where b = b_ih + b_hh and direction 0 = forward, 1 = backward.
    Returns (B, T, 2*H) f32, matching PyTorch RNNEncoder.forward in eval mode."""
    B, T, _ = x_btd.shape
    H = params[0][1].shape[1]
    tc = max(1, min(time_chunk, T))
    n_tb = pl.cdiv(T, tc)
    T_pad = n_tb * tc

    lens_b1 = lengths.astype(jnp.int32).reshape(B, 1)
    x_tbd = jnp.transpose(x_btd, (1, 0, 2))                  # (T, B, D) time-major
    if T_pad != T:
        # padded timesteps are masked in-kernel (t >= lengths), so zeros are fine
        x_tbd = jnp.pad(x_tbd, ((0, T_pad - T), (0, 0), (0, 0)))
    xb = x_tbd.astype(jnp.bfloat16)                          # bf16 operands, f32 accumulate

    prev_f = prev_b = None                                   # (T_pad, B, H) each
    for li, (w_ih, w_hh, b) in enumerate(params):
        wi = w_ih.astype(jnp.bfloat16)
        if li == 0:
            # Hoisted input projection: one big (T*B, D) x (D, 4H) matmul per direction.
            gx_f = jnp.einsum("tbd,dg->tbg", xb, wi[0],
                              preferred_element_type=jnp.float32)
            gx_b = jnp.einsum("tbd,dg->tbg", xb, wi[1],
                              preferred_element_type=jnp.float32)
        else:
            # Contract the previous layer's per-direction outputs against the matching
            # halves of W_ih: this IS the 2H feature concat, without materializing it.
            pf = prev_f.astype(jnp.bfloat16)
            pb = prev_b.astype(jnp.bfloat16)
            gx_f = (jnp.einsum("tbh,hg->tbg", pf, wi[0, :H],
                               preferred_element_type=jnp.float32)
                    + jnp.einsum("tbh,hg->tbg", pb, wi[0, H:],
                                 preferred_element_type=jnp.float32))
            gx_b = (jnp.einsum("tbh,hg->tbg", pf, wi[1, :H],
                               preferred_element_type=jnp.float32)
                    + jnp.einsum("tbh,hg->tbg", pb, wi[1, H:],
                                 preferred_element_type=jnp.float32))
        prev_f, prev_b = _bilstm_recurrence(
            gx_f, gx_b, w_hh.astype(jnp.bfloat16), b.astype(jnp.float32), lens_b1,
            hidden=H, tc=tc)
        # inter-layer dropout: identity (eval mode / drop_prob = 0)

    # final F.dropout(..., training=False) is identity
    out = jnp.stack([prev_f[:T], prev_b[:T]], axis=2)        # (T, B, 2, H): [fwd, bwd]
    return jnp.transpose(out, (1, 0, 2, 3)).reshape(B, T, 2 * H)


def init_params(key, input_size, hidden, num_layers):
    """Deterministic params, PyTorch-LSTM-style U(-1/sqrt(H), 1/sqrt(H)).
    W_ih stored pre-transposed as (2, D_in, 4H), W_hh as (2, H, 4H),
    b = b_ih + b_hh as (2, 4H)."""
    k = 1.0 / math.sqrt(hidden)
    params = []
    d_in = input_size
    for _ in range(num_layers):
        key, k1, k2, k3, k4 = jax.random.split(key, 5)
        w_ih = jax.random.uniform(k1, (2, d_in, 4 * hidden), jnp.float32, -k, k)
        w_hh = jax.random.uniform(k2, (2, hidden, 4 * hidden), jnp.float32, -k, k)
        b = (jax.random.uniform(k3, (2, 4 * hidden), jnp.float32, -k, k)
             + jax.random.uniform(k4, (2, 4 * hidden), jnp.float32, -k, k))
        params.append((w_ih, w_hh, b))
        d_in = 2 * hidden
    return params


# -----------------------------------------------------------------------------
# Pure-JAX reference (same masked-bidirectional-LSTM semantics) for the checks.
# mm_dtype controls the matmul operand dtype (f32 = exact PyTorch math; bf16 =
# the same numerics choice as the kernel, with f32 state/accumulation).
# -----------------------------------------------------------------------------
def _ref_lstm_dir(x_tbd, mask_tb1, wih, whh, b, reverse, mm_dtype, precision):
    T, B, _ = x_tbd.shape
    H = whh.shape[0]
    xs = x_tbd[::-1] if reverse else x_tbd
    ms = mask_tb1[::-1] if reverse else mask_tb1

    def step(carry, inp):
        h, c = carry
        x_t, m_t = inp
        g = (jnp.dot(x_t.astype(mm_dtype), wih.astype(mm_dtype),
                     preferred_element_type=jnp.float32, precision=precision)
             + jnp.dot(h.astype(mm_dtype), whh.astype(mm_dtype),
                       preferred_element_type=jnp.float32, precision=precision)
             + b[None, :])
        i = jax.nn.sigmoid(g[:, :H])
        f = jax.nn.sigmoid(g[:, H:2 * H])
        gg = jnp.tanh(g[:, 2 * H:3 * H])
        o = jax.nn.sigmoid(g[:, 3 * H:])
        c_new = f * c + i * gg
        h_new = o * jnp.tanh(c_new)
        valid = m_t > 0
        return ((jnp.where(valid, h_new, h), jnp.where(valid, c_new, c)),
                jnp.where(valid, h_new, 0.0))

    init = (jnp.zeros((B, H), jnp.float32), jnp.zeros((B, H), jnp.float32))
    _, ys = jax.lax.scan(step, init, (xs, ms))
    return ys[::-1] if reverse else ys


def rnn_encoder_reference(x_btd, lengths, params, *, mm_dtype=jnp.float32, precision=None):
    B, T, _ = x_btd.shape
    mask = (jnp.arange(T)[:, None] < lengths[None, :]).astype(jnp.float32)[:, :, None]
    h = jnp.transpose(x_btd, (1, 0, 2))
    for (w_ih, w_hh, b) in params:
        out_f = _ref_lstm_dir(h, mask, w_ih[0], w_hh[0], b[0], False, mm_dtype, precision)
        out_b = _ref_lstm_dir(h, mask, w_ih[1], w_hh[1], b[1], True, mm_dtype, precision)
        h = jnp.concatenate([out_f, out_b], axis=-1)
    return jnp.transpose(h, (1, 0, 2))


if __name__ == "__main__":
    B, T = 4, 10
    input_size, hidden, num_layers = 16, 32, 2

    key = jax.random.PRNGKey(0)
    key, kx = jax.random.split(key)
    x = jax.random.normal(kx, (B, T, input_size), jnp.float32)
    lengths = jnp.array([10, 7, 3, 5], dtype=jnp.int32)

    params = init_params(key, input_size, hidden, num_layers)

    # time_chunk=4 with T=10 exercises chunking, T-padding (T_pad=12) and the
    # reversed backward block order.
    fwd = jax.jit(functools.partial(rnn_encoder_forward, time_chunk=4))
    out = jax.block_until_ready(fwd(x, lengths, params))
    assert out.shape == (B, T, 2 * hidden), out.shape

    # (1) Structural check: reference using the same bf16-operand / f32-accumulate
    #     numerics as the kernel; residual differences are accumulation-order only.
    ref_bf16 = jax.block_until_ready(
        rnn_encoder_reference(x, lengths, params, mm_dtype=jnp.bfloat16))
    np.testing.assert_allclose(np.asarray(out), np.asarray(ref_bf16),
                               rtol=2e-2, atol=2e-2)

    # (2) Semantics check vs. full-f32 ground truth (PyTorch math); the looser
    #     tolerance accounts solely for bf16 matmul-operand rounding (state and
    #     accumulation stay f32 in the kernel).
    ref_f32 = jax.block_until_ready(
        rnn_encoder_reference(x, lengths, params, mm_dtype=jnp.float32,
                              precision=jax.lax.Precision.HIGHEST))
    np.testing.assert_allclose(np.asarray(out), np.asarray(ref_f32),
                               rtol=6e-2, atol=6e-2)

    # padded positions must be exactly zero (pad_packed_sequence semantics)
    pad_mask = np.asarray(jnp.arange(T)[None, :] >= lengths[:, None])
    assert np.all(np.asarray(out)[pad_mask] == 0.0)

    print("KERNEL_OK")
</pallas_src>

<mosaic_0001>
module attributes {stable_mosaic.version = 11 : i64} {
  func.func @_bilstm_kernel(%arg0: i32, %arg1: memref<4x4x128xf32, #tpu.memory_space<vmem>>, %arg2: memref<4x4x128xf32, #tpu.memory_space<vmem>>, %arg3: memref<2x32x128xbf16, #tpu.memory_space<vmem>>, %arg4: memref<2x128xf32, #tpu.memory_space<vmem>>, %arg5: memref<4x1xi32, #tpu.memory_space<vmem>>, %arg6: memref<4x4x32xf32, #tpu.memory_space<vmem>>, %arg7: memref<4x4x32xf32, #tpu.memory_space<vmem>>, %arg8: memref<2x4x32xf32, #tpu.memory_space<vmem>>, %arg9: memref<2x4x32xf32, #tpu.memory_space<vmem>>) attributes {dimension_semantics = [#tpu.dimension_semantics<arbitrary>], iteration_bounds = array<i64: 3>, scalar_prefetch = 0 : i64, scratch_operands = 2 : i64, tpu.core_type = #tpu.core_type<tc>, window_params = [{transform_indices = @transform_0, window_bounds = array<i64: 4, 4, 128>}, {transform_indices = @transform_1, window_bounds = array<i64: 4, 4, 128>}, {pipeline_mode = #tpu.pipeline_mode<synchronous>, transform_indices = @transform_2, window_bounds = array<i64: 2, 32, 128>}, {pipeline_mode = #tpu.pipeline_mode<synchronous>, transform_indices = @transform_3, window_bounds = array<i64: 2, 128>}, {pipeline_mode = #tpu.pipeline_mode<synchronous>, transform_indices = @transform_4, window_bounds = array<i64: 4, 1>}, {transform_indices = @transform_5, window_bounds = array<i64: 4, 4, 32>}, {transform_indices = @transform_6, window_bounds = array<i64: 4, 4, 32>}]} {
    %c0_i32 = arith.constant 0 : i32
    %0 = arith.cmpi eq, %arg0, %c0_i32 : i32
    %1 = arith.extui %0 : i1 to i32
    %c0_i32_0 = arith.constant 0 : i32
    %2 = arith.cmpi ne, %1, %c0_i32_0 : i32
    scf.if %2 {
      %cst_173 = arith.constant 0.000000e+00 : f32
      %420 = vector.broadcast %cst_173 : f32 to vector<2x4x32xf32>
      %c0_174 = arith.constant 0 : index
      %c0_175 = arith.constant 0 : index
      %c0_176 = arith.constant 0 : index
      %421 = vector.load %arg8[%c0_174, %c0_175, %c0_176] : memref<2x4x32xf32, #tpu.memory_space<vmem>>, vector<2x4x32xf32>
      tpu.vector_store %arg8[%c0_174, %c0_175, %c0_176], %420 {strides = array<i32>} : memref<2x4x32xf32, #tpu.memory_space<vmem>>, vector<2x4x32xf32>,
      %cst_177 = arith.constant 0.000000e+00 : f32
      %422 = vector.broadcast %cst_177 : f32 to vector<2x4x32xf32>
      %c0_178 = arith.constant 0 : index
      %c0_179 = arith.constant 0 : index
      %c0_180 = arith.constant 0 : index
      %423 = vector.load %arg9[%c0_178, %c0_179, %c0_180] : memref<2x4x32xf32, #tpu.memory_space<vmem>>, vector<2x4x32xf32>
      tpu.vector_store %arg9[%c0_178, %c0_179, %c0_180], %422 {strides = array<i32>} : memref<2x4x32xf32, #tpu.memory_space<vmem>>, vector<2x4x32xf32>,
    } else {
    }
    %c0 = arith.constant 0 : index
    %c0_1 = arith.constant 0 : index
    %c0_2 = arith.constant 0 : index
    %3 = vector.load %arg3[%c0, %c0_1, %c0_2] : memref<2x32x128xbf16, #tpu.memory_space<vmem>>, vector<1x32x128xbf16>
    %4 = vector.shape_cast %3 : vector<1x32x128xbf16> to vector<32x128xbf16>
    %c1 = arith.constant 1 : index
    %c0_3 = arith.constant 0 : index
    %c0_4 = arith.constant 0 : index
    %5 = vector.load %arg3[%c1, %c0_3, %c0_4] : memref<2x32x128xbf16, #tpu.memory_space<vmem>>, vector<1x32x128xbf16>
    %6 = vector.shape_cast %5 : vector<1x32x128xbf16> to vector<32x128xbf16>
    %c0_5 = arith.constant 0 : index
    %c0_6 = arith.constant 0 : index
    %7 = vector.load %arg4[%c0_5, %c0_6] : memref<2x128xf32, #tpu.memory_space<vmem>>, vector<2x128xf32>
    %8 = vector.extract_strided_slice %7 {offsets = [0, 0], sizes = [1, 128], strides = [1, 1]} : vector<2x128xf32> to vector<1x128xf32>
    %9 = vector.extract_strided_slice %7 {offsets = [1, 0], sizes = [1, 128], strides = [1, 1]} : vector<2x128xf32> to vector<1x128xf32>
    %c0_7 = arith.constant 0 : index
    %c0_8 = arith.constant 0 : index
    %10 = vector.load %arg5[%c0_7, %c0_8] : memref<4x1xi32, #tpu.memory_space<vmem>>, vector<4x1xi32>
    %11 = vector.shape_cast %10 : vector<4x1xi32> to vector<4x1xi32>
    %12 = vector.broadcast %11 : vector<4x1xi32> to vector<4x32xi32>
    %c4_i32 = arith.constant 4 : i32
    %13 = arith.muli %arg0, %c4_i32 : i32
    %c2_i32 = arith.constant 2 : i32
    %14 = arith.subi %c2_i32, %arg0 : i32
    %c4_i32_9 = arith.constant 4 : i32
    %15 = arith.muli %14, %c4_i32_9 : i32
    %c0_10 = arith.constant 0 : index
    %c0_11 = arith.constant 0 : index
    %c0_12 = arith.constant 0 : index
    %16 = vector.load %arg8[%c0_10, %c0_11, %c0_12] : memref<2x4x32xf32, #tpu.memory_space<vmem>>, vector<1x4x32xf32>
    %17 = vector.shape_cast %16 : vector<1x4x32xf32> to vector<4x32xf32>
    %c0_13 = arith.constant 0 : index
    %c0_14 = arith.constant 0 : index
    %c0_15 = arith.constant 0 : index
    %18 = vector.load %arg9[%c0_13, %c0_14, %c0_15] : memref<2x4x32xf32, #tpu.memory_space<vmem>>, vector<1x4x32xf32>
    %19 = vector.shape_cast %18 : vector<1x4x32xf32> to vector<4x32xf32>
    %c1_16 = arith.constant 1 : index
    %c0_17 = arith.constant 0 : index
    %c0_18 = arith.constant 0 : index
    %20 = vector.load %arg8[%c1_16, %c0_17, %c0_18] : memref<2x4x32xf32, #tpu.memory_space<vmem>>, vector<1x4x32xf32>
    %21 = vector.shape_cast %20 : vector<1x4x32xf32> to vector<4x32xf32>
    %c1_19 = arith.constant 1 : index
    %c0_20 = arith.constant 0 : index
    %c0_21 = arith.constant 0 : index
    %22 = vector.load %arg9[%c1_19, %c0_20, %c0_21] : memref<2x4x32xf32, #tpu.memory_space<vmem>>, vector<1x4x32xf32>
    %23 = vector.shape_cast %22 : vector<1x4x32xf32> to vector<4x32xf32>
    %c0_22 = arith.constant 0 : index
    %c0_23 = arith.constant 0 : index
    %c0_24 = arith.constant 0 : index
    %24 = vector.load %arg1[%c0_22, %c0_23, %c0_24] : memref<4x4x128xf32, #tpu.memory_space<vmem>>, vector<1x4x128xf32>
    %25 = vector.shape_cast %24 : vector<1x4x128xf32> to vector<4x128xf32>
    %26 = vector.broadcast %8 : vector<1x128xf32> to vector<4x128xf32>
    %27 = arith.addf %25, %26 : vector<4x128xf32>
    %28 = arith.truncf %17 : vector<4x32xf32> to vector<4x32xbf16>
    %cst = arith.constant dense<0.000000e+00> : vector<4x128xf32>
    %29 = tpu.matmul %28, %4, %cst {dimension_numbers = #tpu.dot_dimension_numbers<[1], [0], [0], [1], [0, 0, 1, 1], [], []>} : vector<4x32xbf16>, vector<32x128xbf16>, vector<4x128xf32> -> vector<4x128xf32>
    %30 = arith.addf %27, %29 : vector<4x128xf32>
    %c3 = arith.constant 3 : index
    %c0_25 = arith.constant 0 : index
    %c0_26 = arith.constant 0 : index
    %31 = vector.load %arg2[%c3, %c0_25, %c0_26] : memref<4x4x128xf32, #tpu.memory_space<vmem>>, vector<1x4x128xf32>
    %32 = vector.shape_cast %31 : vector<1x4x128xf32> to vector<4x128xf32>
    %33 = vector.broadcast %9 : vector<1x128xf32> to vector<4x128xf32>
    %34 = arith.addf %32, %33 : vector<4x128xf32>
    %35 = arith.truncf %21 : vector<4x32xf32> to vector<4x32xbf16>
    %cst_27 = arith.constant dense<0.000000e+00> : vector<4x128xf32>
    %36 = tpu.matmul %35, %6, %cst_27 {dimension_numbers = #tpu.dot_dimension_numbers<[1], [0], [0], [1], [0, 0, 1, 1], [], []>} : vector<4x32xbf16>, vector<32x128xbf16>, vector<4x128xf32> -> vector<4x128xf32>
    %37 = arith.addf %34, %36 : vector<4x128xf32>
    %38 = vector.extract_strided_slice %30 {offsets = [0, 0], sizes = [4, 32], strides = [1, 1]} : vector<4x128xf32> to vector<4x32xf32>
    %cst_28 = arith.constant 5.000000e-01 : f32
    %39 = vector.broadcast %cst_28 : f32 to vector<4x32xf32>
    %40 = arith.mulf %39, %38 : vector<4x32xf32>
    %41 = math.tanh %40 : vector<4x32xf32>
    %cst_29 = arith.constant 1.000000e+00 : f32
    %42 = vector.broadcast %cst_29 : f32 to vector<4x32xf32>
    %43 = arith.addf %42, %41 : vector<4x32xf32>
    %cst_30 = arith.constant 5.000000e-01 : f32
    %44 = vector.broadcast %cst_30 : f32 to vector<4x32xf32>
    %45 = arith.mulf %44, %43 : vector<4x32xf32>
    %46 = vector.extract_strided_slice %30 {offsets = [0, 32], sizes = [4, 32], strides = [1, 1]} : vector<4x128xf32> to vector<4x32xf32>
    %cst_31 = arith.constant 5.000000e-01 : f32
    %47 = vector.broadcast %cst_31 : f32 to vector<4x32xf32>
    %48 = arith.mulf %47, %46 : vector<4x32xf32>
    %49 = math.tanh %48 : vector<4x32xf32>
    %cst_32 = arith.constant 1.000000e+00 : f32
    %50 = vector.broadcast %cst_32 : f32 to vector<4x32xf32>
    %51 = arith.addf %50, %49 : vector<4x32xf32>
    %cst_33 = arith.constant 5.000000e-01 : f32
    %52 = vector.broadcast %cst_33 : f32 to vector<4x32xf32>
    %53 = arith.mulf %52, %51 : vector<4x32xf32>
    %54 = vector.extract_strided_slice %30 {offsets = [0, 64], sizes = [4, 32], strides = [1, 1]} : vector<4x128xf32> to vector<4x32xf32>
    %55 = math.tanh %54 : vector<4x32xf32>
    %56 = vector.extract_strided_slice %30 {offsets = [0, 96], sizes = [4, 32], strides = [1, 1]} : vector<4x128xf32> to vector<4x32xf32>
    %cst_34 = arith.constant 5.000000e-01 : f32
    %57 = vector.broadcast %cst_34 : f32 to vector<4x32xf32>
    %58 = arith.mulf %57, %56 : vector<4x32xf32>
    %59 = math.tanh %58 : vector<4x32xf32>
    %cst_35 = arith.constant 1.000000e+00 : f32
    %60 = vector.broadcast %cst_35 : f32 to vector<4x32xf32>
    %61 = arith.addf %60, %59 : vector<4x32xf32>
    %cst_36 = arith.constant 5.000000e-01 : f32
    %62 = vector.broadcast %cst_36 : f32 to vector<4x32xf32>
    %63 = arith.mulf %62, %61 : vector<4x32xf32>
    %64 = arith.mulf %53, %19 : vector<4x32xf32>
    %65 = arith.mulf %45, %55 : vector<4x32xf32>
    %66 = arith.addf %64, %65 : vector<4x32xf32>
    %67 = math.tanh %66 : vector<4x32xf32>
    %68 = arith.mulf %63, %67 : vector<4x32xf32>
    %69 = vector.extract_strided_slice %37 {offsets = [0, 0], sizes = [4, 32], strides = [1, 1]} : vector<4x128xf32> to vector<4x32xf32>
    %cst_37 = arith.constant 5.000000e-01 : f32
    %70 = vector.broadcast %cst_37 : f32 to vector<4x32xf32>
    %71 = arith.mulf %70, %69 : vector<4x32xf32>
    %72 = math.tanh %71 : vector<4x32xf32>
    %cst_38 = arith.constant 1.000000e+00 : f32
    %73 = vector.broadcast %cst_38 : f32 to vector<4x32xf32>
    %74 = arith.addf %73, %72 : vector<4x32xf32>
    %cst_39 = arith.constant 5.000000e-01 : f32
    %75 = vector.broadcast %cst_39 : f32 to vector<4x32xf32>
    %76 = arith.mulf %75, %74 : vector<4x32xf32>
    %77 = vector.extract_strided_slice %37 {offsets = [0, 32], sizes = [4, 32], strides = [1, 1]} : vector<4x128xf32> to vector<4x32xf32>
    %cst_40 = arith.constant 5.000000e-01 : f32
    %78 = vector.broadcast %cst_40 : f32 to vector<4x32xf32>
    %79 = arith.mulf %78, %77 : vector<4x32xf32>
    %80 = math.tanh %79 : vector<4x32xf32>
    %cst_41 = arith.constant 1.000000e+00 : f32
    %81 = vector.broadcast %cst_41 : f32 to vector<4x32xf32>
    %82 = arith.addf %81, %80 : vector<4x32xf32>
    %cst_42 = arith.constant 5.000000e-01 : f32
    %83 = vector.broadcast %cst_42 : f32 to vector<4x32xf32>
    %84 = arith.mulf %83, %82 : vector<4x32xf32>
    %85 = vector.extract_strided_slice %37 {offsets = [0, 64], sizes = [4, 32], strides = [1, 1]} : vector<4x128xf32> to vector<4x32xf32>
    %86 = math.tanh %85 : vector<4x32xf32>
    %87 = vector.extract_strided_slice %37 {offsets = [0, 96], sizes = [4, 32], strides = [1, 1]} : vector<4x128xf32> to vector<4x32xf32>
    %cst_43 = arith.constant 5.000000e-01 : f32
    %88 = vector.broadcast %cst_43 : f32 to vector<4x32xf32>
    %89 = arith.mulf %88, %87 : vector<4x32xf32>
    %90 = math.tanh %89 : vector<4x32xf32>
    %cst_44 = arith.constant 1.000000e+00 : f32
    %91 = vector.broadcast %cst_44 : f32 to vector<4x32xf32>
    %92 = arith.addf %91, %90 : vector<4x32xf32>
    %cst_45 = arith.constant 5.000000e-01 : f32
    %93 = vector.broadcast %cst_45 : f32 to vector<4x32xf32>
    %94 = arith.mulf %93, %92 : vector<4x32xf32>
    %95 = arith.mulf %84, %23 : vector<4x32xf32>
    %96 = arith.mulf %76, %86 : vector<4x32xf32>
    %97 = arith.addf %95, %96 : vector<4x32xf32>
    %98 = math.tanh %97 : vector<4x32xf32>
    %99 = arith.mulf %94, %98 : vector<4x32xf32>
    %c0_i32_46 = arith.constant 0 : i32
    %100 = arith.addi %13, %c0_i32_46 : i32
    %101 = vector.broadcast %100 : i32 to vector<4x32xi32>
    %102 = arith.cmpi sgt, %12, %101 : vector<4x32xi32>
    %c3_i32 = arith.constant 3 : i32
    %103 = arith.addi %15, %c3_i32 : i32
    %104 = vector.broadcast %103 : i32 to vector<4x32xi32>
    %105 = arith.cmpi sgt, %12, %104 : vector<4x32xi32>
    %106 = arith.select %102, %68, %17 : vector<4x32xi1>, vector<4x32xf32>
    %107 = arith.select %102, %66, %19 : vector<4x32xi1>, vector<4x32xf32>
    %108 = arith.select %105, %99, %21 : vector<4x32xi1>, vector<4x32xf32>
    %109 = arith.select %105, %97, %23 : vector<4x32xi1>, vector<4x32xf32>
    %cst_47 = arith.constant 0.000000e+00 : f32
    %110 = vector.broadcast %cst_47 : f32 to vector<4x32xf32>
    %111 = arith.select %102, %68, %110 : vector<4x32xi1>, vector<4x32xf32>
    %c0_48 = arith.constant 0 : index
    %c0_49 = arith.constant 0 : index
    %c0_50 = arith.constant 0 : index
    %112 = vector.load %arg6[%c0_48, %c0_49, %c0_50] : memref<4x4x32xf32, #tpu.memory_space<vmem>>, vector<1x4x32xf32>
    %113 = vector.shape_cast %112 : vector<1x4x32xf32> to vector<4x32xf32>
    %114 = vector.shape_cast %111 : vector<4x32xf32> to vector<1x4x32xf32>
    tpu.vector_store %arg6[%c0_48, %c0_49, %c0_50], %114 {strides = array<i32>} : memref<4x4x32xf32, #tpu.memory_space<vmem>>, vector<1x4x32xf32>,
    %cst_51 = arith.constant 0.000000e+00 : f32
    %115 = vector.broadcast %cst_51 : f32 to vector<4x32xf32>
    %116 = arith.select %105, %99, %115 : vector<4x32xi1>, vector<4x32xf32>
    %c3_52 = arith.constant 3 : index
    %c0_53 = arith.constant 0 : index
    %c0_54 = arith.constant 0 : index
    %117 = vector.load %arg7[%c3_52, %c0_53, %c0_54] : memref<4x4x32xf32, #tpu.memory_space<vmem>>, vector<1x4x32xf32>
    %118 = vector.shape_cast %117 : vector<1x4x32xf32> to vector<4x32xf32>
    %119 = vector.shape_cast %116 : vector<4x32xf32> to vector<1x4x32xf32>
    tpu.vector_store %arg7[%c3_52, %c0_53, %c0_54], %119 {strides = array<i32>} : memref<4x4x32xf32, #tpu.memory_space<vmem>>, vector<1x4x32xf32>,
    %c1_55 = arith.constant 1 : index
    %c0_56 = arith.constant 0 : index
    %c0_57 = arith.constant 0 : index
    %120 = vector.load %arg1[%c1_55, %c0_56, %c0_57] : memref<4x4x128xf32, #tpu.memory_space<vmem>>, vector<1x4x128xf32>
    %121 = vector.shape_cast %120 : vector<1x4x128xf32> to vector<4x128xf32>
    %122 = vector.broadcast %8 : vector<1x128xf32> to vector<4x128xf32>
    %123 = arith.addf %121, %122 : vector<4x128xf32>
    %124 = arith.truncf %106 : vector<4x32xf32> to vector<4x32xbf16>
    %cst_58 = arith.constant dense<0.000000e+00> : vector<4x128xf32>
    %125 = tpu.matmul %124, %4, %cst_58 {dimension_numbers = #tpu.dot_dimension_numbers<[1], [0], [0], [1], [0, 0, 1, 1], [], []>} : vector<4x32xbf16>, vector<32x128xbf16>, vector<4x128xf32> -> vector<4x128xf32>
    %126 = arith.addf %123, %125 : vector<4x128xf32>
    %c2 = arith.constant 2 : index
    %c0_59 = arith.constant 0 : index
    %c0_60 = arith.constant 0 : index
    %127 = vector.load %arg2[%c2, %c0_59, %c0_60] : memref<4x4x128xf32, #tpu.memory_space<vmem>>, vector<1x4x128xf32>
    %128 = vector.shape_cast %127 : vector<1x4x128xf32> to vector<4x128xf32>
    %129 = vector.broadcast %9 : vector<1x128xf32> to vector<4x128xf32>
    %130 = arith.addf %128, %129 : vector<4x128xf32>
    %131 = arith.truncf %108 : vector<4x32xf32> to vector<4x32xbf16>
    %cst_61 = arith.constant dense<0.000000e+00> : vector<4x128xf32>
    %132 = tpu.matmul %131, %6, %cst_61 {dimension_numbers = #tpu.dot_dimension_numbers<[1], [0], [0], [1], [0, 0, 1, 1], [], []>} : vector<4x32xbf16>, vector<32x128xbf16>, vector<4x128xf32> -> vector<4x128xf32>
    %133 = arith.addf %130, %132 : vector<4x128xf32>
    %134 = vector.extract_strided_slice %126 {offsets = [0, 0], sizes = [4, 32], strides = [1, 1]} : vector<4x128xf32> to vector<4x32xf32>
    %cst_62 = arith.constant 5.000000e-01 : f32
    %135 = vector.broadcast %cst_62 : f32 to vector<4x32xf32>
    %136 = arith.mulf %135, %134 : vector<4x32xf32>
    %137 = math.tanh %136 : vector<4x32xf32>
    %cst_63 = arith.constant 1.000000e+00 : f32
    %138 = vector.broadcast %cst_63 : f32 to vector<4x32xf32>
    %139 = arith.addf %138, %137 : vector<4x32xf32>
    %cst_64 = arith.constant 5.000000e-01 : f32
    %140 = vector.broadcast %cst_64 : f32 to vector<4x32xf32>
    %141 = arith.mulf %140, %139 : vector<4x32xf32>
    %142 = vector.extract_strided_slice %126 {offsets = [0, 32], sizes = [4, 32], strides = [1, 1]} : vector<4x128xf32> to vector<4x32xf32>
    %cst_65 = arith.constant 5.000000e-01 : f32
    %143 = vector.broadcast %cst_65 : f32 to vector<4x32xf32>
    %144 = arith.mulf %143, %142 : vector<4x32xf32>
    %145 = math.tanh %144 : vector<4x32xf32>
    %cst_66 = arith.constant 1.000000e+00 : f32
    %146 = vector.broadcast %cst_66 : f32 to vector<4x32xf32>
    %147 = arith.addf %146, %145 : vector<4x32xf32>
    %cst_67 = arith.constant 5.000000e-01 : f32
    %148 = vector.broadcast %cst_67 : f32 to vector<4x32xf32>
    %149 = arith.mulf %148, %147 : vector<4x32xf32>
    %150 = vector.extract_strided_slice %126 {offsets = [0, 64], sizes = [4, 32], strides = [1, 1]} : vector<4x128xf32> to vector<4x32xf32>
    %151 = math.tanh %150 : vector<4x32xf32>
    %152 = vector.extract_strided_slice %126 {offsets = [0, 96], sizes = [4, 32], strides = [1, 1]} : vector<4x128xf32> to vector<4x32xf32>
    %cst_68 = arith.constant 5.000000e-01 : f32
    %153 = vector.broadcast %cst_68 : f32 to vector<4x32xf32>
    %154 = arith.mulf %153, %152 : vector<4x32xf32>
    %155 = math.tanh %154 : vector<4x32xf32>
    %cst_69 = arith.constant 1.000000e+00 : f32
    %156 = vector.broadcast %cst_69 : f32 to vector<4x32xf32>
    %157 = arith.addf %156, %155 : vector<4x32xf32>
    %cst_70 = arith.constant 5.000000e-01 : f32
    %158 = vector.broadcast %cst_70 : f32 to vector<4x32xf32>
    %159 = arith.mulf %158, %157 : vector<4x32xf32>
    %160 = arith.mulf %149, %107 : vector<4x32xf32>
    %161 = arith.mulf %141, %151 : vector<4x32xf32>
    %162 = arith.addf %160, %161 : vector<4x32xf32>
    %163 = math.tanh %162 : vector<4x32xf32>
    %164 = arith.mulf %159, %163 : vector<4x32xf32>
    %165 = vector.extract_strided_slice %133 {offsets = [0, 0], sizes = [4, 32], strides = [1, 1]} : vector<4x128xf32> to vector<4x32xf32>
    %cst_71 = arith.constant 5.000000e-01 : f32
    %166 = vector.broadcast %cst_71 : f32 to vector<4x32xf32>
    %167 = arith.mulf %166, %165 : vector<4x32xf32>
    %168 = math.tanh %167 : vector<4x32xf32>
    %cst_72 = arith.constant 1.000000e+00 : f32
    %169 = vector.broadcast %cst_72 : f32 to vector<4x32xf32>
    %170 = arith.addf %169, %168 : vector<4x32xf32>
    %cst_73 = arith.constant 5.000000e-01 : f32
    %171 = vector.broadcast %cst_73 : f32 to vector<4x32xf32>
    %172 = arith.mulf %171, %170 : vector<4x32xf32>
    %173 = vector.extract_strided_slice %133 {offsets = [0, 32], sizes = [4, 32], strides = [1, 1]} : vector<4x128xf32> to vector<4x32xf32>
    %cst_74 = arith.constant 5.000000e-01 : f32
    %174 = vector.broadcast %cst_74 : f32 to vector<4x32xf32>
    %175 = arith.mulf %174, %173 : vector<4x32xf32>
    %176 = math.tanh %175 : vector<4x32xf32>
    %cst_75 = arith.constant 1.000000e+00 : f32
    %177 = vector.broadcast %cst_75 : f32 to vector<4x32xf32>
    %178 = arith.addf %177, %176 : vector<4x32xf32>
    %cst_76 = arith.constant 5.000000e-01 : f32
    %179 = vector.broadcast %cst_76 : f32 to vector<4x32xf32>
    %180 = arith.mulf %179, %178 : vector<4x32xf32>
    %181 = vector.extract_strided_slice %133 {offsets = [0, 64], sizes = [4, 32], strides = [1, 1]} : vector<4x128xf32> to vector<4x32xf32>
    %182 = math.tanh %181 : vector<4x32xf32>
    %183 = vector.extract_strided_slice %133 {offsets = [0, 96], sizes = [4, 32], strides = [1, 1]} : vector<4x128xf32> to vector<4x32xf32>
    %cst_77 = arith.constant 5.000000e-01 : f32
    %184 = vector.broadcast %cst_77 : f32 to vector<4x32xf32>
    %185 = arith.mulf %184, %183 : vector<4x32xf32>
    %186 = math.tanh %185 : vector<4x32xf32>
    %cst_78 = arith.constant 1.000000e+00 : f32
    %187 = vector.broadcast %cst_78 : f32 to vector<4x32xf32>
    %188 = arith.addf %187, %186 : vector<4x32xf32>
    %cst_79 = arith.constant 5.000000e-01 : f32
    %189 = vector.broadcast %cst_79 : f32 to vector<4x32xf32>
    %190 = arith.mulf %189, %188 : vector<4x32xf32>
    %191 = arith.mulf %180, %109 : vector<4x32xf32>
    %192 = arith.mulf %172, %182 : vector<4x32xf32>
    %193 = arith.addf %191, %192 : vector<4x32xf32>
    %194 = math.tanh %193 : vector<4x32xf32>
    %195 = arith.mulf %190, %194 : vector<4x32xf32>
    %c1_i32 = arith.constant 1 : i32
    %196 = arith.addi %13, %c1_i32 : i32
    %197 = vector.broadcast %196 : i32 to vector<4x32xi32>
    %198 = arith.cmpi sgt, %12, %197 : vector<4x32xi32>
    %c2_i32_80 = arith.constant 2 : i32
    %199 = arith.addi %15, %c2_i32_80 : i32
    %200 = vector.broadcast %199 : i32 to vector<4x32xi32>
    %201 = arith.cmpi sgt, %12, %200 : vector<4x32xi32>
    %202 = arith.select %198, %164, %106 : vector<4x32xi1>, vector<4x32xf32>
    %203 = arith.select %198, %162, %107 : vector<4x32xi1>, vector<4x32xf32>
    %204 = arith.select %201, %195, %108 : vector<4x32xi1>, vector<4x32xf32>
    %205 = arith.select %201, %193, %109 : vector<4x32xi1>, vector<4x32xf32>
    %cst_81 = arith.constant 0.000000e+00 : f32
    %206 = vector.broadcast %cst_81 : f32 to vector<4x32xf32>
    %207 = arith.select %198, %164, %206 : vector<4x32xi1>, vector<4x32xf32>
    %c1_82 = arith.constant 1 : index
    %c0_83 = arith.constant 0 : index
    %c0_84 = arith.constant 0 : index
    %208 = vector.load %arg6[%c1_82, %c0_83, %c0_84] : memref<4x4x32xf32, #tpu.memory_space<vmem>>, vector<1x4x32xf32>
    %209 = vector.shape_cast %208 : vector<1x4x32xf32> to vector<4x32xf32>
    %210 = vector.shape_cast %207 : vector<4x32xf32> to vector<1x4x32xf32>
    tpu.vector_store %arg6[%c1_82, %c0_83, %c0_84], %210 {strides = array<i32>} : memref<4x4x32xf32, #tpu.memory_space<vmem>>, vector<1x4x32xf32>,
    %cst_85 = arith.constant 0.000000e+00 : f32
    %211 = vector.broadcast %cst_85 : f32 to vector<4x32xf32>
    %212 = arith.select %201, %195, %211 : vector<4x32xi1>, vector<4x32xf32>
    %c2_86 = arith.constant 2 : index
    %c0_87 = arith.constant 0 : index
    %c0_88 = arith.constant 0 : index
    %213 = vector.load %arg7[%c2_86, %c0_87, %c0_88] : memref<4x4x32xf32, #tpu.memory_space<vmem>>, vector<1x4x32xf32>
    %214 = vector.shape_cast %213 : vector<1x4x32xf32> to vector<4x32xf32>
    %215 = vector.shape_cast %212 : vector<4x32xf32> to vector<1x4x32xf32>
    tpu.vector_store %arg7[%c2_86, %c0_87, %c0_88], %215 {strides = array<i32>} : memref<4x4x32xf32, #tpu.memory_space<vmem>>, vector<1x4x32xf32>,
    %c2_89 = arith.constant 2 : index
    %c0_90 = arith.constant 0 : index
    %c0_91 = arith.constant 0 : index
    %216 = vector.load %arg1[%c2_89, %c0_90, %c0_91] : memref<4x4x128xf32, #tpu.memory_space<vmem>>, vector<1x4x128xf32>
    %217 = vector.shape_cast %216 : vector<1x4x128xf32> to vector<4x128xf32>
    %218 = vector.broadcast %8 : vector<1x128xf32> to vector<4x128xf32>
    %219 = arith.addf %217, %218 : vector<4x128xf32>
    %220 = arith.truncf %202 : vector<4x32xf32> to vector<4x32xbf16>
    %cst_92 = arith.constant dense<0.000000e+00> : vector<4x128xf32>
    %221 = tpu.matmul %220, %4, %cst_92 {dimension_numbers = #tpu.dot_dimension_numbers<[1], [0], [0], [1], [0, 0, 1, 1], [], []>} : vector<4x32xbf16>, vector<32x128xbf16>, vector<4x128xf32> -> vector<4x128xf32>
    %222 = arith.addf %219, %221 : vector<4x128xf32>
    %c1_93 = arith.constant 1 : index
    %c0_94 = arith.constant 0 : index
    %c0_95 = arith.constant 0 : index
    %223 = vector.load %arg2[%c1_93, %c0_94, %c0_95] : memref<4x4x128xf32, #tpu.memory_space<vmem>>, vector<1x4x128xf32>
    %224 = vector.shape_cast %223 : vector<1x4x128xf32> to vector<4x128xf32>
    %225 = vector.broadcast %9 : vector<1x128xf32> to vector<4x128xf32>
    %226 = arith.addf %224, %225 : vector<4x128xf32>
    %227 = arith.truncf %204 : vector<4x32xf32> to vector<4x32xbf16>
    %cst_96 = arith.constant dense<0.000000e+00> : vector<4x128xf32>
    %228 = tpu.matmul %227, %6, %cst_96 {dimension_numbers = #tpu.dot_dimension_numbers<[1], [0], [0], [1], [0, 0, 1, 1], [], []>} : vector<4x32xbf16>, vector<32x128xbf16>, vector<4x128xf32> -> vector<4x128xf32>
    %229 = arith.addf %226, %228 : vector<4x128xf32>
    %230 = vector.extract_strided_slice %222 {offsets = [0, 0], sizes = [4, 32], strides = [1, 1]} : vector<4x128xf32> to vector<4x32xf32>
    %cst_97 = arith.constant 5.000000e-01 : f32
    %231 = vector.broadcast %cst_97 : f32 to vector<4x32xf32>
    %232 = arith.mulf %231, %230 : vector<4x32xf32>
    %233 = math.tanh %232 : vector<4x32xf32>
    %cst_98 = arith.constant 1.000000e+00 : f32
    %234 = vector.broadcast %cst_98 : f32 to vector<4x32xf32>
    %235 = arith.addf %234, %233 : vector<4x32xf32>
    %cst_99 = arith.constant 5.000000e-01 : f32
    %236 = vector.broadcast %cst_99 : f32 to vector<4x32xf32>
    %237 = arith.mulf %236, %235 : vector<4x32xf32>
    %238 = vector.extract_strided_slice %222 {offsets = [0, 32], sizes = [4, 32], strides = [1, 1]} : vector<4x128xf32> to vector<4x32xf32>
    %cst_100 = arith.constant 5.000000e-01 : f32
    %239 = vector.broadcast %cst_100 : f32 to vector<4x32xf32>
    %240 = arith.mulf %239, %238 : vector<4x32xf32>
    %241 = math.tanh %240 : vector<4x32xf32>
    %cst_101 = arith.constant 1.000000e+00 : f32
    %242 = vector.broadcast %cst_101 : f32 to vector<4x32xf32>
    %243 = arith.addf %242, %241 : vector<4x32xf32>
    %cst_102 = arith.constant 5.000000e-01 : f32
    %244 = vector.broadcast %cst_102 : f32 to vector<4x32xf32>
    %245 = arith.mulf %244, %243 : vector<4x32xf32>
    %246 = vector.extract_strided_slice %222 {offsets = [0, 64], sizes = [4, 32], strides = [1, 1]} : vector<4x128xf32> to vector<4x32xf32>
    %247 = math.tanh %246 : vector<4x32xf32>
    %248 = vector.extract_strided_slice %222 {offsets = [0, 96], sizes = [4, 32], strides = [1, 1]} : vector<4x128xf32> to vector<4x32xf32>
    %cst_103 = arith.constant 5.000000e-01 : f32
    %249 = vector.broadcast %cst_103 : f32 to vector<4x32xf32>
    %250 = arith.mulf %249, %248 : vector<4x32xf32>
    %251 = math.tanh %250 : vector<4x32xf32>
    %cst_104 = arith.constant 1.000000e+00 : f32
    %252 = vector.broadcast %cst_104 : f32 to vector<4x32xf32>
    %253 = arith.addf %252, %251 : vector<4x32xf32>
    %cst_105 = arith.constant 5.000000e-01 : f32
    %254 = vector.broadcast %cst_105 : f32 to vector<4x32xf32>
    %255 = arith.mulf %254, %253 : vector<4x32xf32>
    %256 = arith.mulf %245, %203 : vector<4x32xf32>
    %257 = arith.mulf %237, %247 : vector<4x32xf32>
    %258 = arith.addf %256, %257 : vector<4x32xf32>
    %259 = math.tanh %258 : vector<4x32xf32>
    %260 = arith.mulf %255, %259 : vector<4x32xf32>
    %261 = vector.extract_strided_slice %229 {offsets = [0, 0], sizes = [4, 32], strides = [1, 1]} : vector<4x128xf32> to vector<4x32xf32>
    %cst_106 = arith.constant 5.000000e-01 : f32
    %262 = vector.broadcast %cst_106 : f32 to vector<4x32xf32>
    %263 = arith.mulf %262, %261 : vector<4x32xf32>
    %264 = math.tanh %263 : vector<4x32xf32>
    %cst_107 = arith.constant 1.000000e+00 : f32
    %265 = vector.broadcast %cst_107 : f32 to vector<4x32xf32>
    %266 = arith.addf %265, %264 : vector<4x32xf32>
    %cst_108 = arith.constant 5.000000e-01 : f32
    %267 = vector.broadcast %cst_108 : f32 to vector<4x32xf32>
    %268 = arith.mulf %267, %266 : vector<4x32xf32>
    %269 = vector.extract_strided_slice %229 {offsets = [0, 32], sizes = [4, 32], strides = [1, 1]} : vector<4x128xf32> to vector<4x32xf32>
    %cst_109 = arith.constant 5.000000e-01 : f32
    %270 = vector.broadcast %cst_109 : f32 to vector<4x32xf32>
    %271 = arith.mulf %270, %269 : vector<4x32xf32>
    %272 = math.tanh %271 : vector<4x32xf32>
    %cst_110 = arith.constant 1.000000e+00 : f32
    %273 = vector.broadcast %cst_110 : f32 to vector<4x32xf32>
    %274 = arith.addf %273, %272 : vector<4x32xf32>
    %cst_111 = arith.constant 5.000000e-01 : f32
    %275 = vector.broadcast %cst_111 : f32 to vector<4x32xf32>
    %276 = arith.mulf %275, %274 : vector<4x32xf32>
    %277 = vector.extract_strided_slice %229 {offsets = [0, 64], sizes = [4, 32], strides = [1, 1]} : vector<4x128xf32> to vector<4x32xf32>
    %278 = math.tanh %277 : vector<4x32xf32>
    %279 = vector.extract_strided_slice %229 {offsets = [0, 96], sizes = [4, 32], strides = [1, 1]} : vector<4x128xf32> to vector<4x32xf32>
    %cst_112 = arith.constant 5.000000e-01 : f32
    %280 = vector.broadcast %cst_112 : f32 to vector<4x32xf32>
    %281 = arith.mulf %280, %279 : vector<4x32xf32>
    %282 = math.tanh %281 : vector<4x32xf32>
    %cst_113 = arith.constant 1.000000e+00 : f32
    %283 = vector.broadcast %cst_113 : f32 to vector<4x32xf32>
    %284 = arith.addf %283, %282 : vector<4x32xf32>
    %cst_114 = arith.constant 5.000000e-01 : f32
    %285 = vector.broadcast %cst_114 : f32 to vector<4x32xf32>
    %286 = arith.mulf %285, %284 : vector<4x32xf32>
    %287 = arith.mulf %276, %205 : vector<4x32xf32>
    %288 = arith.mulf %268, %278 : vector<4x32xf32>
    %289 = arith.addf %287, %288 : vector<4x32xf32>
    %290 = math.tanh %289 : vector<4x32xf32>
    %291 = arith.mulf %286, %290 : vector<4x32xf32>
    %c2_i32_115 = arith.constant 2 : i32
    %292 = arith.addi %13, %c2_i32_115 : i32
    %293 = vector.broadcast %292 : i32 to vector<4x32xi32>
    %294 = arith.cmpi sgt, %12, %293 : vector<4x32xi32>
    %c1_i32_116 = arith.constant 1 : i32
    %295 = arith.addi %15, %c1_i32_116 : i32
    %296 = vector.broadcast %295 : i32 to vector<4x32xi32>
    %297 = arith.cmpi sgt, %12, %296 : vector<4x32xi32>
    %298 = arith.select %294, %260, %202 : vector<4x32xi1>, vector<4x32xf32>
    %299 = arith.select %294, %258, %203 : vector<4x32xi1>, vector<4x32xf32>
    %300 = arith.select %297, %291, %204 : vector<4x32xi1>, vector<4x32xf32>
    %301 = arith.select %297, %289, %205 : vector<4x32xi1>, vector<4x32xf32>
    %cst_117 = arith.constant 0.000000e+00 : f32
    %302 = vector.broadcast %cst_117 : f32 to vector<4x32xf32>
    %303 = arith.select %294, %260, %302 : vector<4x32xi1>, vector<4x32xf32>
    %c2_118 = arith.constant 2 : index
    %c0_119 = arith.constant 0 : index
    %c0_120 = arith.constant 0 : index
    %304 = vector.load %arg6[%c2_118, %c0_119, %c0_120] : memref<4x4x32xf32, #tpu.memory_space<vmem>>, vector<1x4x32xf32>
    %305 = vector.shape_cast %304 : vector<1x4x32xf32> to vector<4x32xf32>
    %306 = vector.shape_cast %303 : vector<4x32xf32> to vector<1x4x32xf32>
    tpu.vector_store %arg6[%c2_118, %c0_119, %c0_120], %306 {strides = array<i32>} : memref<4x4x32xf32, #tpu.memory_space<vmem>>, vector<1x4x32xf32>,
    %cst_121 = arith.constant 0.000000e+00 : f32
    %307 = vector.broadcast %cst_121 : f32 to vector<4x32xf32>
    %308 = arith.select %297, %291, %307 : vector<4x32xi1>, vector<4x32xf32>
    %c1_122 = arith.constant 1 : index
    %c0_123 = arith.constant 0 : index
    %c0_124 = arith.constant 0 : index
    %309 = vector.load %arg7[%c1_122, %c0_123, %c0_124] : memref<4x4x32xf32, #tpu.memory_space<vmem>>, vector<1x4x32xf32>
    %310 = vector.shape_cast %309 : vector<1x4x32xf32> to vector<4x32xf32>
    %311 = vector.shape_cast %308 : vector<4x32xf32> to vector<1x4x32xf32>
    tpu.vector_store %arg7[%c1_122, %c0_123, %c0_124], %311 {strides = array<i32>} : memref<4x4x32xf32, #tpu.memory_space<vmem>>, vector<1x4x32xf32>,
    %c3_125 = arith.constant 3 : index
    %c0_126 = arith.constant 0 : index
    %c0_127 = arith.constant 0 : index
    %312 = vector.load %arg1[%c3_125, %c0_126, %c0_127] : memref<4x4x128xf32, #tpu.memory_space<vmem>>, vector<1x4x128xf32>
    %313 = vector.shape_cast %312 : vector<1x4x128xf32> to vector<4x128xf32>
    %314 = vector.broadcast %8 : vector<1x128xf32> to vector<4x128xf32>
    %315 = arith.addf %313, %314 : vector<4x128xf32>
    %316 = arith.truncf %298 : vector<4x32xf32> to vector<4x32xbf16>
    %cst_128 = arith.constant dense<0.000000e+00> : vector<4x128xf32>
    %317 = tpu.matmul %316, %4, %cst_128 {dimension_numbers = #tpu.dot_dimension_numbers<[1], [0], [0], [1], [0, 0, 1, 1], [], []>} : vector<4x32xbf16>, vector<32x128xbf16>, vector<4x128xf32> -> vector<4x128xf32>
    %318 = arith.addf %315, %317 : vector<4x128xf32>
    %c0_129 = arith.constant 0 : index
    %c0_130 = arith.constant 0 : index
    %c0_131 = arith.constant 0 : index
    %319 = vector.load %arg2[%c0_129, %c0_130, %c0_131] : memref<4x4x128xf32, #tpu.memory_space<vmem>>, vector<1x4x128xf32>
    %320 = vector.shape_cast %319 : vector<1x4x128xf32> to vector<4x128xf32>
    %321 = vector.broadcast %9 : vector<1x128xf32> to vector<4x128xf32>
    %322 = arith.addf %320, %321 : vector<4x128xf32>
    %323 = arith.truncf %300 : vector<4x32xf32> to vector<4x32xbf16>
    %cst_132 = arith.constant dense<0.000000e+00> : vector<4x128xf32>
    %324 = tpu.matmul %323, %6, %cst_132 {dimension_numbers = #tpu.dot_dimension_numbers<[1], [0], [0], [1], [0, 0, 1, 1], [], []>} : vector<4x32xbf16>, vector<32x128xbf16>, vector<4x128xf32> -> vector<4x128xf32>
    %325 = arith.addf %322, %324 : vector<4x128xf32>
    %326 = vector.extract_strided_slice %318 {offsets = [0, 0], sizes = [4, 32], strides = [1, 1]} : vector<4x128xf32> to vector<4x32xf32>
    %cst_133 = arith.constant 5.000000e-01 : f32
    %327 = vector.broadcast %cst_133 : f32 to vector<4x32xf32>
    %328 = arith.mulf %327, %326 : vector<4x32xf32>
    %329 = math.tanh %328 : vector<4x32xf32>
    %cst_134 = arith.constant 1.000000e+00 : f32
    %330 = vector.broadcast %cst_134 : f32 to vector<4x32xf32>
    %331 = arith.addf %330, %329 : vector<4x32xf32>
    %cst_135 = arith.constant 5.000000e-01 : f32
    %332 = vector.broadcast %cst_135 : f32 to vector<4x32xf32>
    %333 = arith.mulf %332, %331 : vector<4x32xf32>
    %334 = vector.extract_strided_slice %318 {offsets = [0, 32], sizes = [4, 32], strides = [1, 1]} : vector<4x128xf32> to vector<4x32xf32>
    %cst_136 = arith.constant 5.000000e-01 : f32
    %335 = vector.broadcast %cst_136 : f32 to vector<4x32xf32>
    %336 = arith.mulf %335, %334 : vector<4x32xf32>
    %337 = math.tanh %336 : vector<4x32xf32>
    %cst_137 = arith.constant 1.000000e+00 : f32
    %338 = vector.broadcast %cst_137 : f32 to vector<4x32xf32>
    %339 = arith.addf %338, %337 : vector<4x32xf32>
    %cst_138 = arith.constant 5.000000e-01 : f32
    %340 = vector.broadcast %cst_138 : f32 to vector<4x32xf32>
    %341 = arith.mulf %340, %339 : vector<4x32xf32>
    %342 = vector.extract_strided_slice %318 {offsets = [0, 64], sizes = [4, 32], strides = [1, 1]} : vector<4x128xf32> to vector<4x32xf32>
    %343 = math.tanh %342 : vector<4x32xf32>
    %344 = vector.extract_strided_slice %318 {offsets = [0, 96], sizes = [4, 32], strides = [1, 1]} : vector<4x128xf32> to vector<4x32xf32>
    %cst_139 = arith.constant 5.000000e-01 : f32
    %345 = vector.broadcast %cst_139 : f32 to vector<4x32xf32>
    %346 = arith.mulf %345, %344 : vector<4x32xf32>
    %347 = math.tanh %346 : vector<4x32xf32>
    %cst_140 = arith.constant 1.000000e+00 : f32
    %348 = vector.broadcast %cst_140 : f32 to vector<4x32xf32>
    %349 = arith.addf %348, %347 : vector<4x32xf32>
    %cst_141 = arith.constant 5.000000e-01 : f32
    %350 = vector.broadcast %cst_141 : f32 to vector<4x32xf32>
    %351 = arith.mulf %350, %349 : vector<4x32xf32>
    %352 = arith.mulf %341, %299 : vector<4x32xf32>
    %353 = arith.mulf %333, %343 : vector<4x32xf32>
    %354 = arith.addf %352, %353 : vector<4x32xf32>
    %355 = math.tanh %354 : vector<4x32xf32>
    %356 = arith.mulf %351, %355 : vector<4x32xf32>
    %357 = vector.extract_strided_slice %325 {offsets = [0, 0], sizes = [4, 32], strides = [1, 1]} : vector<4x128xf32> to vector<4x32xf32>
    %cst_142 = arith.constant 5.000000e-01 : f32
    %358 = vector.broadcast %cst_142 : f32 to vector<4x32xf32>
    %359 = arith.mulf %358, %357 : vector<4x32xf32>
    %360 = math.tanh %359 : vector<4x32xf32>
    %cst_143 = arith.constant 1.000000e+00 : f32
    %361 = vector.broadcast %cst_143 : f32 to vector<4x32xf32>
    %362 = arith.addf %361, %360 : vector<4x32xf32>
    %cst_144 = arith.constant 5.000000e-01 : f32
    %363 = vector.broadcast %cst_144 : f32 to vector<4x32xf32>
    %364 = arith.mulf %363, %362 : vector<4x32xf32>
    %365 = vector.extract_strided_slice %325 {offsets = [0, 32], sizes = [4, 32], strides = [1, 1]} : vector<4x128xf32> to vector<4x32xf32>
    %cst_145 = arith.constant 5.000000e-01 : f32
    %366 = vector.broadcast %cst_145 : f32 to vector<4x32xf32>
    %367 = arith.mulf %366, %365 : vector<4x32xf32>
    %368 = math.tanh %367 : vector<4x32xf32>
    %cst_146 = arith.constant 1.000000e+00 : f32
    %369 = vector.broadcast %cst_146 : f32 to vector<4x32xf32>
    %370 = arith.addf %369, %368 : vector<4x32xf32>
    %cst_147 = arith.constant 5.000000e-01 : f32
    %371 = vector.broadcast %cst_147 : f32 to vector<4x32xf32>
    %372 = arith.mulf %371, %370 : vector<4x32xf32>
    %373 = vector.extract_strided_slice %325 {offsets = [0, 64], sizes = [4, 32], strides = [1, 1]} : vector<4x128xf32> to vector<4x32xf32>
    %374 = math.tanh %373 : vector<4x32xf32>
    %375 = vector.extract_strided_slice %325 {offsets = [0, 96], sizes = [4, 32], strides = [1, 1]} : vector<4x128xf32> to vector<4x32xf32>
    %cst_148 = arith.constant 5.000000e-01 : f32
    %376 = vector.broadcast %cst_148 : f32 to vector<4x32xf32>
    %377 = arith.mulf %376, %375 : vector<4x32xf32>
    %378 = math.tanh %377 : vector<4x32xf32>
    %cst_149 = arith.constant 1.000000e+00 : f32
    %379 = vector.broadcast %cst_149 : f32 to vector<4x32xf32>
    %380 = arith.addf %379, %378 : vector<4x32xf32>
    %cst_150 = arith.constant 5.000000e-01 : f32
    %381 = vector.broadcast %cst_150 : f32 to vector<4x32xf32>
    %382 = arith.mulf %381, %380 : vector<4x32xf32>
    %383 = arith.mulf %372, %301 : vector<4x32xf32>
    %384 = arith.mulf %364, %374 : vector<4x32xf32>
    %385 = arith.addf %383, %384 : vector<4x32xf32>
    %386 = math.tanh %385 : vector<4x32xf32>
    %387 = arith.mulf %382, %386 : vector<4x32xf32>
    %c3_i32_151 = arith.constant 3 : i32
    %388 = arith.addi %13, %c3_i32_151 : i32
    %389 = vector.broadcast %388 : i32 to vector<4x32xi32>
    %390 = arith.cmpi sgt, %12, %389 : vector<4x32xi32>
    %c0_i32_152 = arith.constant 0 : i32
    %391 = arith.addi %15, %c0_i32_152 : i32
    %392 = vector.broadcast %391 : i32 to vector<4x32xi32>
    %393 = arith.cmpi sgt, %12, %392 : vector<4x32xi32>
    %394 = arith.select %390, %356, %298 : vector<4x32xi1>, vector<4x32xf32>
    %395 = arith.select %390, %354, %299 : vector<4x32xi1>, vector<4x32xf32>
    %396 = arith.select %393, %387, %300 : vector<4x32xi1>, vector<4x32xf32>
    %397 = arith.select %393, %385, %301 : vector<4x32xi1>, vector<4x32xf32>
    %cst_153 = arith.constant 0.000000e+00 : f32
    %398 = vector.broadcast %cst_153 : f32 to vector<4x32xf32>
    %399 = arith.select %390, %356, %398 : vector<4x32xi1>, vector<4x32xf32>
    %c3_154 = arith.constant 3 : index
    %c0_155 = arith.constant 0 : index
    %c0_156 = arith.constant 0 : index
    %400 = vector.load %arg6[%c3_154, %c0_155, %c0_156] : memref<4x4x32xf32, #tpu.memory_space<vmem>>, vector<1x4x32xf32>
    %401 = vector.shape_cast %400 : vector<1x4x32xf32> to vector<4x32xf32>
    %402 = vector.shape_cast %399 : vector<4x32xf32> to vector<1x4x32xf32>
    tpu.vector_store %arg6[%c3_154, %c0_155, %c0_156], %402 {strides = array<i32>} : memref<4x4x32xf32, #tpu.memory_space<vmem>>, vector<1x4x32xf32>,
    %cst_157 = arith.constant 0.000000e+00 : f32
    %403 = vector.broadcast %cst_157 : f32 to vector<4x32xf32>
    %404 = arith.select %393, %387, %403 : vector<4x32xi1>, vector<4x32xf32>
    %c0_158 = arith.constant 0 : index
    %c0_159 = arith.constant 0 : index
    %c0_160 = arith.constant 0 : index
    %405 = vector.load %arg7[%c0_158, %c0_159, %c0_160] : memref<4x4x32xf32, #tpu.memory_space<vmem>>, vector<1x4x32xf32>
    %406 = vector.shape_cast %405 : vector<1x4x32xf32> to vector<4x32xf32>
    %407 = vector.shape_cast %404 : vector<4x32xf32> to vector<1x4x32xf32>
    tpu.vector_store %arg7[%c0_158, %c0_159, %c0_160], %407 {strides = array<i32>} : memref<4x4x32xf32, #tpu.memory_space<vmem>>, vector<1x4x32xf32>,
    %c0_161 = arith.constant 0 : index
    %c0_162 = arith.constant 0 : index
    %c0_163 = arith.constant 0 : index
    %408 = vector.load %arg8[%c0_161, %c0_162, %c0_163] : memref<2x4x32xf32, #tpu.memory_space<vmem>>, vector<1x4x32xf32>
    %409 = vector.shape_cast %408 : vector<1x4x32xf32> to vector<4x32xf32>
    %410 = vector.shape_cast %394 : vector<4x32xf32> to vector<1x4x32xf32>
    tpu.vector_store %arg8[%c0_161, %c0_162, %c0_163], %410 {strides = array<i32>} : memref<2x4x32xf32, #tpu.memory_space<vmem>>, vector<1x4x32xf32>,
    %c0_164 = arith.constant 0 : index
    %c0_165 = arith.constant 0 : index
    %c0_166 = arith.constant 0 : index
    %411 = vector.load %arg9[%c0_164, %c0_165, %c0_166] : memref<2x4x32xf32, #tpu.memory_space<vmem>>, vector<1x4x32xf32>
    %412 = vector.shape_cast %411 : vector<1x4x32xf32> to vector<4x32xf32>
    %413 = vector.shape_cast %395 : vector<4x32xf32> to vector<1x4x32xf32>
    tpu.vector_store %arg9[%c0_164, %c0_165, %c0_166], %413 {strides = array<i32>} : memref<2x4x32xf32, #tpu.memory_space<vmem>>, vector<1x4x32xf32>,
    %c1_167 = arith.constant 1 : index
    %c0_168 = arith.constant 0 : index
    %c0_169 = arith.constant 0 : index
    %414 = vector.load %arg8[%c1_167, %c0_168, %c0_169] : memref<2x4x32xf32, #tpu.memory_space<vmem>>, vector<1x4x32xf32>
    %415 = vector.shape_cast %414 : vector<1x4x32xf32> to vector<4x32xf32>
    %416 = vector.shape_cast %396 : vector<4x32xf32> to vector<1x4x32xf32>
    tpu.vector_store %arg8[%c1_167, %c0_168, %c0_169], %416 {strides = array<i32>} : memref<2x4x32xf32, #tpu.memory_space<vmem>>, vector<1x4x32xf32>,
    %c1_170 = arith.constant 1 : index
    %c0_171 = arith.constant 0 : index
    %c0_172 = arith.constant 0 : index
    %417 = vector.load %arg9[%c1_170, %c0_171, %c0_172] : memref<2x4x32xf32, #tpu.memory_space<vmem>>, vector<1x4x32xf32>
    %418 = vector.shape_cast %417 : vector<1x4x32xf32> to vector<4x32xf32>
    %419 = vector.shape_cast %397 : vector<4x32xf32> to vector<1x4x32xf32>
    tpu.vector_store %arg9[%c1_170, %c0_171, %c0_172], %419 {strides = array<i32>} : memref<2x4x32xf32, #tpu.memory_space<vmem>>, vector<1x4x32xf32>,
    return
  }
  func.func @transform_0(%arg0: i32) -> (i32, i32, i32) {
    %c0_i32 = arith.constant 0 : i32
    %c0_i32_0 = arith.constant 0 : i32
    %c0_i32_1 = arith.constant 0 : i32
    return %arg0, %c0_i32, %c0_i32_0 : i32, i32, i32
  }
  func.func @transform_1(%arg0: i32) -> (i32, i32, i32) {
    %c2_i32 = arith.constant 2 : i32
    %0 = arith.subi %c2_i32, %arg0 : i32
    %c0_i32 = arith.constant 0 : i32
    %c0_i32_0 = arith.constant 0 : i32
    %c0_i32_1 = arith.constant 0 : i32
    return %0, %c0_i32, %c0_i32_0 : i32, i32, i32
  }
  func.func @transform_2(%arg0: i32) -> (i32, i32, i32) {
    %c0_i32 = arith.constant 0 : i32
    %c0_i32_0 = arith.constant 0 : i32
    %c0_i32_1 = arith.constant 0 : i32
    %c0_i32_2 = arith.constant 0 : i32
    return %c0_i32, %c0_i32_0, %c0_i32_1 : i32, i32, i32
  }
  func.func @transform_3(%arg0: i32) -> (i32, i32) {
    %c0_i32 = arith.constant 0 : i32
    %c0_i32_0 = arith.constant 0 : i32
    %c0_i32_1 = arith.constant 0 : i32
    return %c0_i32, %c0_i32_0 : i32, i32
  }
  func.func @transform_4(%arg0: i32) -> (i32, i32) {
    %c0_i32 = arith.constant 0 : i32
    %c0_i32_0 = arith.constant 0 : i32
    %c0_i32_1 = arith.constant 0 : i32
    return %c0_i32, %c0_i32_0 : i32, i32
  }
  func.func @transform_5(%arg0: i32) -> (i32, i32, i32) {
    %c0_i32 = arith.constant 0 : i32
    %c0_i32_0 = arith.constant 0 : i32
    %c0_i32_1 = arith.constant 0 : i32
    return %arg0, %c0_i32, %c0_i32_0 : i32, i32, i32
  }
  func.func @transform_6(%arg0: i32) -> (i32, i32, i32) {
    %c2_i32 = arith.constant 2 : i32
    %0 = arith.subi %c2_i32, %arg0 : i32
    %c0_i32 = arith.constant 0 : i32
    %c0_i32_0 = arith.constant 0 : i32
    %c0_i32_1 = arith.constant 0 : i32
    return %0, %c0_i32, %c0_i32_0 : i32, i32, i32
  }
}

</mosaic_0001>

<bundles_post_ra>
// kernel: rnn_encoder_forward.2
= control target key start
LH: loop header
LB: loop body
LE: loop exit
PB: predicated region body
PF: predicated region fallthrough
CT: control target
= control target key end

     0   :  { %s1431_s21 = smov 0   ;;  %s1848_s0 = inlined_call_operand.vmem [shape: f32[12,4,128], index: 0, kind: input, shape index: {}]   ;;  %s1849_s1 = inlined_call_operand.vmem [shape: f32[12,4,128], index: 1, kind: input, shape index: {}]   ;;  %s1850_s2 = inlined_call_operand.vmem [shape: bf16[2,32,128], index: 2, kind: input, shape index: {}]   ;;  %s1851_s3 = inlined_call_operand.vmem [shape: f32[2,128], index: 3, kind: input, shape index: {}]   ;;  %s1852_s4 = inlined_call_operand.vmem [shape: s32[4,1], index: 4, kind: input, shape index: {}]   ;;  %s1853_s5 = inlined_call_operand.vmem [shape: f32[12,4,32], index: 5, kind: output, shape index: {0}]   ;;  %s1854_s6 = inlined_call_operand.vmem [shape: f32[12,4,32], index: 6, kind: output, shape index: {1}]  }
   0x1 LB: > { %s1179_s22 = sadd.s32 4294967295, %s1387_s21   ;;  %p1183_p0 = scmp.ge.s32.totalorder %s1387_s21, 1  ;;  %s1387_s21 = sphi %s1431_s21, %s17_s21  }
   0x2   : > { %p233_p1 = scmp.lt.s32.totalorder %s1387_s21, 4 }
   0x4   : > { %p234_p2 = pnand %p1183_p0, %p233_p1 }
   0x5   : > { %s1439_s23 = sshll.u32 (!%p234_p2), %s1179_s22, 2  ;;  %s281_s24 = ssub.s32 (!%p234_p2), 2, %s1179_s22 }
   0x6   : > { %237 = sbr.rel (%p234_p2) target bundleno = 2807 (0xaf7), region = 40  ;;  %p276_p3 = scmp.lt.s32.totalorder (!%p234_p2), %s1439_s23, 11 }
   0x7   : > { %s1442_s25 = sshll.u32 (!%p234_p2), %s281_s24, 2  ;;  %p1192_p5 = scmp.ne.s32.totalorder (!%p234_p2), %s1179_s22, 0 }
   0x8   : > { %p283_p4 = scmp.lt.s32.totalorder (!%p234_p2), %s1442_s25, 11 }
   0xb   : > { %s277_s26 = scalar_select %p276_p3, %s1439_s23, 11 }
   0xc   : > { %s284_s27 = scalar_select %p283_p4, %s1442_s25, 11 }
   0xd   : > { %s1185_s28 = sshll.u32 %s277_s26, 2  ;;  %307 = sbr.rel (%p1192_p5) target bundleno = 21 (0x15), region = 44 }
   0xe   : > { %s1450_s7 = scalar_lea.vmem %s1848_s0, %s1185_s28  ;;  %s1187_s8 = sshll.u32 %s284_s27, 2 }
   0xf   : > { %s1455_s11 = scalar_lea.vmem %s1849_s1, %s1187_s8  ;;  %s1460_s14 = scalar_lea.vmem %s1853_s5, %s1185_s28 }
  0x10   : > { %s1465_s17 = scalar_lea.vmem %s1854_s6, %s1187_s8 }
  0x12   : > { %vm308_vm0 = vcmask 257024   ;;  %v1389_v0 = vmov 0.0  }
  0x13   : > { %309 = vst.msk [vmem:[#allocation2] sm:$0xf] %vm308_vm0, %v1389_v0  ;;  %310 = vst.msk [vmem:[#allocation2 + $0x4] sm:$0xf] %vm308_vm0, %v1389_v0 }
  0x14   : > { %311 = vst.msk [vmem:[#allocation3] sm:$0xf] %vm308_vm0, %v1389_v0  ;;  %312 = vst.msk [vmem:[#allocation3 + $0x4] sm:$0xf] %vm308_vm0, %v1389_v0 }
  0x15 PF: > { %v1470_v1 = vld [vmem:[%s1850_s2 + $0x8] sm:$0xff]   ;;  %v1390_v2 = vmov 0.0   ;;  %v1477_v3 = vld [vmem:[%s1850_s2 + $0x18] sm:$0xff]   ;;  %v1483_v4 = vld [vmem:[%s1850_s2] sm:$0xff]   ;;  %vm1391_vm1 = vmmov 0   ;;  %s1392_s29 = smov 32   ;;  %v337_v12 = vlaneseq  ;;  %v516_v60 = vstv %s1439_s23 }
  0x16   : > { %1249 = vmatprep.subr.bf16.mxu0 %v1390_v2  ;;  %1257 = vmatprep.subr.bf16.mxu1 %v1390_v2  ;;  %v1492_v5 = vld [vmem:[%s1850_s2 + $0x10] sm:$0xff]   ;;  %vm355_vm2 = vcmask 261120   ;;  %v322_v15 = vld [vmem:[%s1851_s3] sm:$0x3]  ;;  %v1202_v20 = vld [vmem:[%s1455_s11 + $0xc] sm:$0xf] }
  0x17   : > { %1250 = vmatpush3.bf16.msra.mxu0 %v1470_v1  ;;  %1253 = vmatprep.mubr.msk.bf16.mxu0 %vm1391_vm1, %v1390_v2  ;;  %v338_v13 = vshrl.u32 %v337_v12, 7  ;;  %v336_v18 = vld [vmem:[%s1450_s7] sm:$0xf]  ;;  %v1393_v33 = vmov 0   ;;  %s1394_s9 = smov 64   ;;  %s1395_s13 = smov 96  }
  0x18   : > { %1258 = vmatpush3.bf16.msra.mxu1 %v1477_v3  ;;  %1251 = vmatprep.subr.bf16.mxu0 %v1390_v2  ;;  %v323_v47 = vld [vmem:[%s1852_s4] sm:$0xf]  ;;  %s518_s15 = sadd.s32 3, %s1442_s25  ;;  %s693_s16 = sadd.s32 1, %s1439_s23  ;;  %vm538_vm11 = vcmask 257024  }
  0x19   : > { %1259 = vmatprep.subr.bf16.mxu1 %v1390_v2  ;;  %1261 = vmatprep.mubr.msk.bf16.mxu1 %vm1391_vm1, %v1390_v2  ;;  %v339_v14 = vsub.s32 0, %v338_v13  ;;  %v404_v16 = vsub.s32 1, %v338_v13  ;;  %s696_s18 = sadd.s32 2, %s1442_s25  ;;  %s863_s19 = sadd.s32 2, %s1439_s23 }
  0x1a   : > { %v1497_v6 = vld [vmem:[#allocation2] sm:$0xf]  ;;  %v1499_v7 = vld [vmem:[#allocation2 + $0x4] sm:$0xf]  ;;  %1328 = vset.pattern.permute.xlu0 %v1393_v33  ;;  %s866_s20 = sadd.s32 1, %s1442_s25 }
  0x1b   : > { %v331_v8 = vld [vmem:[#allocation3] sm:$0xf]  ;;  %v342_v9 = vpack.c.bf16 %v1497_v6, %v1497_v6  ;;  %1252 = vmatpush3.bf16.msra.mxu0 %v1483_v4  ;;  %v407_v10 = vpack.c.bf16 %v1499_v7, %v1499_v7  ;;  %v335_v11 = vld [vmem:[#allocation3 + $0x4] sm:$0xf]  ;;  %v1528_v17 = vrot.slane %v322_v15, %v339_v14  ;;  %v1531_v19 = vrot.slane %v322_v15, %v404_v16  ;;  %v1207_v16 = vld [vmem:[%s1450_s7 + $0x4] sm:$0xf] }
  0x1c   : > { %470 = vrot.lane.b32.xlu1 %v331_v8, %s1392_s29  ;;  %1260 = vmatpush3.bf16.msra.mxu1 %v1492_v5 }
  0x1d   : > { %1265 = vmatprep.subr.bf16.mxu0 %v1390_v2  ;;  %1273 = vmatprep.subr.bf16.mxu1 %v1390_v2  ;;  %v341_v21 = vadd.f32 %v1528_v17, %v336_v18  ;;  %v406_v22 = vadd.f32 %v1202_v20, %v1531_v19  ;;  %v549_v18 = vadd.f32 %v1207_v16, %v1528_v17  ;;  %v1215_v16 = vld [vmem:[%s1455_s11 + $0x4] sm:$0xf] }
  0x1e   : > { %1254 = vmatmul.mubr.msk.bf16.vlgmr.msra.gmra.mxu0 %vm355_vm2, %v342_v9  ;;  %v1579_v9 = vstv %s518_s15 }
  0x1f   : > { %1262 = vmatmul.mubr.msk.bf16.vlgmr.msra.gmra.mxu1 %vm355_vm2, %v407_v10  ;;  %1266 = vmatpush3.bf16.msra.mxu0 %v1470_v1 }
  0x20   : > { %496 = vrot.lane.b32.xlu1 %v335_v11, %s1392_s29  ;;  %1267 = vmatprep.subr.bf16.mxu0 %v1390_v2 }
  0x21   : > { %1274 = vmatpush3.bf16.msra.mxu1 %v1477_v3  ;;  %1269 = vmatprep.mubr.msk.bf16.mxu0 %vm1391_vm1, %v1390_v2 }
  0x22   : > { %1275 = vmatprep.subr.bf16.mxu1 %v1390_v2  ;;  %1277 = vmatprep.mubr.msk.bf16.mxu1 %vm1391_vm1, %v1390_v2 }
  0x23   : > { %1268 = vmatpush3.bf16.msra.mxu0 %v1483_v4 }
  0x24   : > { %1281 = vmatprep.subr.bf16.mxu0 %v1390_v2 }
  0x25   : > { %1276 = vmatpush3.bf16.msra.mxu1 %v1492_v5 }
  0x26   : > { %1289 = vmatprep.subr.bf16.mxu1 %v1390_v2 }
  0x8e   : > { %v1545_v49 = vpop.permute.xlu1 %470 }
  0x92   : > { %v1548_v51 = vpop.permute.xlu1 %496 }
  0xde   : > { %v393_v23 = vpop.f32.mrf.mxu0 }
  0xdf   : > { %v399_v24 = vadd.f32 %v393_v23, %v341_v21  ;;  %v457_v25 = vpop.f32.mrf.mxu1  ;;  %v1209_v21 = vld [vmem:[%s1455_s11 + $0x8] sm:$0xf] }
  0xe0   : > { %v463_v26 = vadd.f32 %v457_v25, %v406_v22  ;;  %v1255_v27 = vpop.f32.mrf.mxu0 }
  0xe1   : > { %1333 = vtanh.f32 %v399_v24  ;;  %v1263_v28 = vpop.f32.mrf.mxu1  ;;  %v464_v36 = vmul.f32 0.5, %v399_v24  ;;  %v600_v24 = vadd.f32 %v1209_v21, %v1531_v19 }
  0xe2   : > { %v396_v29 = vpop.f32.mrf.mxu0  ;;  %1335 = vtanh.f32 %v463_v26  ;;  %v490_v37 = vmul.f32 0.5, %v463_v26 }
  0xe3   : > { %v460_v30 = vpop.f32.mrf.mxu1  ;;  %1337 = vtanh.f32 %v464_v36 }
  0xe4   : > { %v1256_v31 = vpop.f32.mrf.mxu0  ;;  %1339 = vtanh.f32 %v490_v37 }
  0xe5   : > { %v1264_v32 = vpop.f32.mrf.mxu1 }
  0xee   : > { %v1334_v34 = vpop.eup %1333 }
  0xef   : > { %475 = vrot.lane.b32.xlu0 %v1334_v34, %s1394_s9  ;;  %v1336_v35 = vpop.eup %1335 }
  0xf0   : > { %v1338_v38 = vpop.eup %1337 }
  0xf1   : > { %v466_v39 = vadd.f32 1.0, %v1338_v38  ;;  %v1340_v40 = vpop.eup %1339 }
  0xf2   : > { %v492_v41 = vadd.f32 1.0, %v1340_v40 }
  0xf3   : > { %501 = vrot.lane.b32.xlu0 %v1336_v35, %s1394_s9  ;;  %v467_v42 = vmul.f32 0.5, %v466_v39 }
  0xf4   : > { %v493_v45 = vmul.f32 0.5, %v492_v41 }
  0xf5   : > { %v473_v50 = vmul.f32 %v1545_v49, %v467_v42 }
  0xf6   : > { %v499_v54 = vmul.f32 %v1548_v51, %v493_v45 }
 0x161   : > { %v476_v43 = vpop.permute.xlu0 %475 }
 0x162   : > { %v478_v44 = vmul.f32 %v476_v43, %v467_v42 }
 0x164   : > { %480 = vrot.lane.b32.xlu0 %v478_v44, %s1392_s29 }
 0x165   : > { %v502_v46 = vpop.permute.xlu0 %501 }
 0x166   : > { %v504_v48 = vmul.f32 %v502_v46, %v493_v45 }
 0x168   : > { %506 = vrot.lane.b32.xlu1 %v504_v48, %s1392_s29  ;;  %325 = vperm.xlu0 %1328, %v323_v47  }
 0x16c   : > { %522 = vrot.lane.b32.xlu0 %v1497_v6, %s1395_s13 }
 0x1d6   : > { %v481_v52 = vpop.permute.xlu0 %480 }
 0x1d7   : > { %v1550_v53 = vadd.f32 %v481_v52, %v473_v50 }
 0x1d9   : > { %1341 = vtanh.f32 %v1550_v53 }
 0x1da   : > { %v507_v55 = vpop.permute.xlu1 %506 }
 0x1db   : > { %v1554_v56 = vadd.f32 %v507_v55, %v499_v54 }
 0x1dd   : > { %1343 = vtanh.f32 %v1554_v56 }
 0x1e3   : > { %v1561_v59 = vpop.permute.xlu0 %325 }
 0x1e4   : > { %vm1567_vm3 = vcmp.gt.s32.totalorder %v1561_v59, %v516_v60  ;;  %vm520_vm4 = vcmp.gt.s32.totalorder %v1561_v59, %v1579_v9 }
 0x1e5   : > { %v1621_v46 = vsel %vm1567_vm3, %v1550_v53, %v1545_v49  ;;  %v1632_v52 = vsel %vm520_vm4, %v1554_v56, %v1548_v51 }
 0x1e6   : > { %v1342_v57 = vpop.eup %1341 }
 0x1e7   : > { %486 = vrot.lane.b32.xlu1 %v1342_v57, %s1394_s9  ;;  %v523_v62 = vpop.permute.xlu0 %522 }
 0x1ea   : > { %v1344_v58 = vpop.eup %1343 }
 0x1eb   : > { %512 = vrot.lane.b32.xlu1 %v1344_v58, %s1394_s9  ;;  %v1641_v58 = vstv %s693_s16 }
 0x1ec   : > { %vm695_vm5 = vcmp.gt.s32.totalorder %v1561_v59, %v1641_v58 }
 0x1ef   : > { %528 = vrot.lane.b32.xlu1 %v1499_v7, %s1395_s13 }
 0x259   : > { %v487_v61 = vpop.permute.xlu1 %486 }
 0x25a   : > { %v1564_v63 = vmul.f32 %v487_v61, %v467_v42 }
 0x25c   : > { %v1575_v6 = vsel %vm1567_vm3, %v1564_v63, %v523_v62  ;;  %v1657_v62 = vstv %s696_s18 }
 0x25d   : > { %v550_v7 = vpack.c.bf16 %v1575_v6, %v1575_v6  ;;  %v513_v8 = vpop.permute.xlu1 %512  ;;  %vm698_vm6 = vcmp.gt.s32.totalorder %v1561_v59, %v1657_v62 }
 0x25e   : > { %v1582_v10 = vmul.f32 %v513_v8, %v493_v45 }
 0x25f   : > { %552 = vrot.lane.b32.xlu0 %v550_v7, %s1392_s29 }
 0x261   : > { %v529_v11 = vpop.permute.xlu1 %528 }
 0x262   : > { %v1590_v12 = vsel %vm520_vm4, %v1582_v10, %v529_v11 }
 0x263   : > { %v601_v13 = vpack.c.bf16 %v1590_v12, %v1590_v12 }
 0x265   : > { %603 = vrot.lane.b32.xlu1 %v601_v13, %s1392_s29 }
 0x2d1   : > { %v553_v14 = vpop.permute.xlu0 %552 }
 0x2d2   : > { %1270 = vmatmul.mubr.msk.bf16.vlgmr.msra.gmra.mxu0 %vm355_vm2, %v553_v14 }
 0x2d3   : > { %1282 = vmatpush3.bf16.msra.mxu0 %v1470_v1  ;;  %1285 = vmatprep.mubr.msk.bf16.mxu0 %vm1391_vm1, %v1390_v2 }
 0x2d4   : > { %1283 = vmatprep.subr.bf16.mxu0 %v1390_v2 }
 0x2d7   : > { %v604_v15 = vpop.permute.xlu1 %603  ;;  %1284 = vmatpush3.bf16.msra.mxu0 %v1483_v4 }
 0x2d8   : > { %1278 = vmatmul.mubr.msk.bf16.vlgmr.msra.gmra.mxu1 %vm355_vm2, %v604_v15  ;;  %1297 = vmatprep.subr.bf16.mxu0 %v1390_v2 }
 0x2d9   : > { %1290 = vmatpush3.bf16.msra.mxu1 %v1477_v3  ;;  %1293 = vmatprep.mubr.msk.bf16.mxu1 %vm1391_vm1, %v1390_v2 }
 0x2da   : > { %1291 = vmatprep.subr.bf16.mxu1 %v1390_v2 }
 0x2dd   : > { %1292 = vmatpush3.bf16.msra.mxu1 %v1492_v5 }
 0x2de   : > { %1305 = vmatprep.subr.bf16.mxu1 %v1390_v2 }
 0x392   : > { %v591_v20 = vpop.f32.mrf.mxu0 }
 0x393   : > { %v597_v22 = vadd.f32 %v591_v20, %v549_v18 }
 0x394   : > { %v1271_v23 = vpop.f32.mrf.mxu0 }
 0x395   : > { %1345 = vtanh.f32 %v597_v22  ;;  %v649_v34 = vmul.f32 0.5, %v597_v22 }
 0x396   : > { %v594_v25 = vpop.f32.mrf.mxu0 }
 0x398   : > { %v1272_v26 = vpop.f32.mrf.mxu0  ;;  %v642_v27 = vpop.f32.mrf.mxu1 }
 0x399   : > { %v648_v28 = vadd.f32 %v642_v27, %v600_v24 }
 0x39a   : > { %v1279_v29 = vpop.f32.mrf.mxu1 }
 0x39b   : > { %1347 = vtanh.f32 %v648_v28  ;;  %v671_v35 = vmul.f32 0.5, %v648_v28 }
 0x39c   : > { %v645_v30 = vpop.f32.mrf.mxu1  ;;  %1349 = vtanh.f32 %v649_v34 }
 0x39d   : > { %1351 = vtanh.f32 %v671_v35 }
 0x39e   : > { %v1280_v31 = vpop.f32.mrf.mxu1 }
 0x3a2   : > { %v1346_v32 = vpop.eup %1345 }
 0x3a3   : > { %656 = vrot.lane.b32.xlu0 %v1346_v32, %s1394_s9 }
 0x3a8   : > { %v1348_v33 = vpop.eup %1347 }
 0x3a9   : > { %678 = vrot.lane.b32.xlu1 %v1348_v33, %s1394_s9  ;;  %v1350_v36 = vpop.eup %1349 }
 0x3aa   : > { %v651_v37 = vadd.f32 1.0, %v1350_v36  ;;  %v1352_v38 = vpop.eup %1351 }
 0x3ab   : > { %v673_v42 = vadd.f32 1.0, %v1352_v38 }
 0x3ac   : > { %v652_v39 = vmul.f32 0.5, %v651_v37 }
 0x3ad   : > { %v674_v43 = vmul.f32 0.5, %v673_v42 }
 0x3ae   : > { %v654_v47 = vmul.f32 %v652_v39, %v1621_v46 }
 0x3af   : > { %v676_v54 = vmul.f32 %v674_v43, %v1632_v52 }
 0x415   : > { %v657_v40 = vpop.permute.xlu0 %656 }
 0x416   : > { %v659_v41 = vmul.f32 %v657_v40, %v652_v39 }
 0x418   : > { %661 = vrot.lane.b32.xlu0 %v659_v41, %s1392_s29 }
 0x41b   : > { %v679_v44 = vpop.permute.xlu1 %678 }
 0x41c   : > { %v681_v45 = vmul.f32 %v679_v44, %v674_v43 }
 0x41e   : > { %683 = vrot.lane.b32.xlu1 %v681_v45, %s1392_s29 }
 0x48a   : > { %v662_v48 = vpop.permute.xlu0 %661 }
 0x48b   : > { %v1624_v50 = vadd.f32 %v662_v48, %v654_v47 }
 0x48d   : > { %1353 = vtanh.f32 %v1624_v50 }
 0x490   : > { %v684_v55 = vpop.permute.xlu1 %683 }
 0x491   : > { %v1635_v49 = vadd.f32 %v684_v55, %v676_v54 }
 0x493   : > { %1355 = vtanh.f32 %v1635_v49 }
 0x49a   : > { %v1354_v53 = vpop.eup %1353 }
 0x49b   : > { %667 = vrot.lane.b32.xlu0 %v1354_v53, %s1394_s9  ;;  %v1735_v53 = vstv %s866_s20 }
 0x49c   : > { %vm868_vm8 = vcmp.gt.s32.totalorder %v1561_v59, %v1735_v53 }
 0x4a0   : > { %v1356_v57 = vpop.eup %1355 }
 0x4a1   : > { %689 = vrot.lane.b32.xlu1 %v1356_v57, %s1394_s9 }
 0x50d   : > { %v668_v60 = vpop.permute.xlu0 %667 }
 0x50e   : > { %v1643_v61 = vmul.f32 %v668_v60, %v652_v39  ;;  %v1699_v39 = vsel %vm695_vm5, %v1624_v50, %v1621_v46  ;;  %v1719_v50 = vstv %s863_s19 }
 0x50f   : > { %vm865_vm7 = vcmp.gt.s32.totalorder %v1561_v59, %v1719_v50 }
 0x510   : > { %v1653_v51 = vsel %vm695_vm5, %v1643_v61, %v1575_v6 }
 0x511   : > { %v720_v56 = vpack.c.bf16 %v1653_v51, %v1653_v51 }
 0x513   : > { %v690_v7 = vpop.permute.xlu1 %689  ;;  %722 = vrot.lane.b32.xlu0 %v720_v56, %s1392_s29 }
 0x514   : > { %v1660_v8 = vmul.f32 %v690_v7, %v674_v43  ;;  %v1710_v43 = vsel %vm698_vm6, %v1635_v49, %v1632_v52 }
 0x516   : > { %v1669_v6 = vsel %vm698_vm6, %v1660_v8, %v1590_v12  ;;  %v710_v0 = vsel %vm698_vm6, %v1660_v8, 0.0 }
 0x517   : > { %v771_v11 = vpack.c.bf16 %v1669_v6, %v1669_v6 }
 0x519   : > { %773 = vrot.lane.b32.xlu1 %v771_v11, %s1392_s29 }
 0x585   : > { %v723_v13 = vpop.permute.xlu0 %722 }
 0x586   : > { %1286 = vmatmul.mubr.msk.bf16.vlgmr.msra.gmra.mxu0 %vm355_vm2, %v723_v13  ;;  %v1219_v13 = vld [vmem:[%s1450_s7 + $0xc] sm:$0xf] }
 0x587   : > { %1298 = vmatpush3.bf16.msra.mxu0 %v1470_v1  ;;  %1301 = vmatprep.mubr.msk.bf16.mxu0 %vm1391_vm1, %v1390_v2  ;;  %v1213_v1 = vld [vmem:[%s1450_s7 + $0x8] sm:$0xf] }
 0x588   : > { %1299 = vmatprep.subr.bf16.mxu0 %v1390_v2  ;;  %v719_v12 = vadd.f32 %v1213_v1, %v1528_v17 }
 0x58b   : > { %v774_v14 = vpop.permute.xlu1 %773  ;;  %1300 = vmatpush3.bf16.msra.mxu0 %v1483_v4  ;;  %v770_v4 = vadd.f32 %v1215_v16, %v1531_v19 }
 0x58c   : > { %1294 = vmatmul.mubr.msk.bf16.vlgmr.msra.gmra.mxu1 %vm355_vm2, %v774_v14  ;;  %v889_v14 = vadd.f32 %v1219_v13, %v1528_v17 }
 0x58d   : > { %1306 = vmatpush3.bf16.msra.mxu1 %v1477_v3  ;;  %1309 = vmatprep.mubr.msk.bf16.mxu1 %vm1391_vm1, %v1390_v2 }
 0x58e   : > { %1307 = vmatprep.subr.bf16.mxu1 %v1390_v2 }
 0x591   : > { %1308 = vmatpush3.bf16.msra.mxu1 %v1492_v5 }
 0x646   : > { %v761_v15 = vpop.f32.mrf.mxu0 }
 0x647   : > { %v767_v18 = vadd.f32 %v761_v15, %v719_v12  ;;  %v938_v12 = vld [vmem:[%s1455_s11] sm:$0xf] }
 0x648   : > { %v1287_v20 = vpop.f32.mrf.mxu0 }
 0x649   : > { %1357 = vtanh.f32 %v767_v18  ;;  %v819_v27 = vmul.f32 0.5, %v767_v18 }
 0x64a   : > { %v764_v21 = vpop.f32.mrf.mxu0 }
 0x64c   : > { %v1288_v22 = vpop.f32.mrf.mxu0  ;;  %v812_v3 = vpop.f32.mrf.mxu1 }
 0x64d   : > { %v818_v23 = vadd.f32 %v812_v3, %v770_v4 }
 0x64e   : > { %v1295_v24 = vpop.f32.mrf.mxu1 }
 0x64f   : > { %1359 = vtanh.f32 %v818_v23  ;;  %v841_v28 = vmul.f32 0.5, %v818_v23 }
 0x650   : > { %v815_v25 = vpop.f32.mrf.mxu1  ;;  %1361 = vtanh.f32 %v819_v27 }
 0x651   : > { %1363 = vtanh.f32 %v841_v28 }
 0x652   : > { %v1296_v2 = vpop.f32.mrf.mxu1 }
 0x656   : > { %v1358_v26 = vpop.eup %1357 }
 0x657   : > { %826 = vrot.lane.b32.xlu0 %v1358_v26, %s1394_s9 }
 0x65c   : > { %v1360_v5 = vpop.eup %1359 }
 0x65d   : > { %848 = vrot.lane.b32.xlu1 %v1360_v5, %s1394_s9  ;;  %v1362_v29 = vpop.eup %1361 }
 0x65e   : > { %v821_v30 = vadd.f32 1.0, %v1362_v29  ;;  %v1364_v31 = vpop.eup %1363 }
 0x65f   : > { %v843_v35 = vadd.f32 1.0, %v1364_v31 }
 0x660   : > { %v822_v32 = vmul.f32 0.5, %v821_v30 }
 0x661   : > { %v844_v36 = vmul.f32 0.5, %v843_v35 }
 0x662   : > { %v824_v40 = vmul.f32 %v822_v32, %v1699_v39 }
 0x663   : > { %v846_v44 = vmul.f32 %v844_v36, %v1710_v43 }
 0x6c9   : > { %v827_v33 = vpop.permute.xlu0 %826 }
 0x6ca   : > { %v829_v34 = vmul.f32 %v827_v33, %v822_v32 }
 0x6cc   : > { %831 = vrot.lane.b32.xlu0 %v829_v34, %s1392_s29 }
 0x6cf   : > { %v849_v37 = vpop.permute.xlu1 %848 }
 0x6d0   : > { %v851_v38 = vmul.f32 %v849_v37, %v844_v36 }
 0x6d2   : > { %853 = vrot.lane.b32.xlu1 %v851_v38, %s1392_s29 }
 0x73e   : > { %v832_v41 = vpop.permute.xlu0 %831 }
 0x73f   : > { %v1702_v42 = vadd.f32 %v832_v41, %v824_v40  ;;  %v1035_v41 = vstv %s1442_s25  ;;  %s1032_s25 = sadd.s32 3, %s1439_s23 }
 0x740   : > { %vm1774_vm9 = vcmp.gt.s32.totalorder %v1561_v59, %v1035_v41 }
 0x741   : > { %1365 = vtanh.f32 %v1702_v42  ;;  %v870_v34 = vsel %vm865_vm7, %v1702_v42, %v1699_v39 }
 0x744   : > { %v854_v45 = vpop.permute.xlu1 %853 }
 0x745   : > { %v1713_v46 = vadd.f32 %v854_v45, %v846_v44 }
 0x747   : > { %1367 = vtanh.f32 %v1713_v46  ;;  %v872_v38 = vsel %vm868_vm8, %v1713_v46, %v1710_v43  ;;  %v533_v43 = vsel %vm1567_vm3, %v1564_v63, 0.0 }
 0x74e   : > { %v1366_v47 = vpop.eup %1365 }
 0x74f   : > { %837 = vrot.lane.b32.xlu0 %v1366_v47, %s1394_s9 }
 0x754   : > { %v1368_v48 = vpop.eup %1367 }
 0x755   : > { %859 = vrot.lane.b32.xlu1 %v1368_v48, %s1394_s9  ;;  %v703_v48 = vsel %vm695_vm5, %v1643_v61, 0.0 }
 0x7c1   : > { %v838_v54 = vpop.permute.xlu0 %837 }
 0x7c2   : > { %v1721_v55 = vmul.f32 %v838_v54, %v822_v32  ;;  %v540_v54 = vsel %vm520_vm4, %v1582_v10, 0.0  ;;  %v1033_v10 = vstv %s1032_s25 }
 0x7c3   : > { %vm1034_vm10 = vcmp.gt.s32.totalorder %v1561_v59, %v1033_v10 }
 0x7c4   : > { %v1731_v52 = vsel %vm865_vm7, %v1721_v55, %v1653_v51  ;;  %v873_v63 = vsel %vm865_vm7, %v1721_v55, 0.0 }
 0x7c5   : > { %v890_v49 = vpack.c.bf16 %v1731_v52, %v1731_v52 }
 0x7c7   : > { %v860_v57 = vpop.permute.xlu1 %859  ;;  %892 = vrot.lane.b32.xlu0 %v890_v49, %s1392_s29 }
 0x7c8   : > { %v1738_v60 = vmul.f32 %v860_v57, %v844_v36 }
 0x7ca   : > { %v1747_v51 = vsel %vm868_vm8, %v1738_v60, %v1669_v6  ;;  %v939_v6 = vadd.f32 %v938_v12, %v1531_v19  ;;  %v880_v9 = vsel %vm868_vm8, %v1738_v60, 0.0 }
 0x7cb   : > { %v940_v56 = vpack.c.bf16 %v1747_v51, %v1747_v51 }
 0x7cd   : > { %942 = vrot.lane.b32.xlu1 %v940_v56, %s1392_s29 }
 0x839   : > { %v893_v7 = vpop.permute.xlu0 %892 }
 0x83a   : > { %1302 = vmatmul.mubr.msk.bf16.vlgmr.msra.gmra.mxu0 %vm355_vm2, %v893_v7 }
 0x83f   : > { %v943_v11 = vpop.permute.xlu1 %942 }
 0x840   : > { %1310 = vmatmul.mubr.msk.bf16.vlgmr.msra.gmra.mxu1 %vm355_vm2, %v943_v11 }
 0x8fa   : > { %v931_v1 = vpop.f32.mrf.mxu0 }
 0x8fb   : > { %v937_v15 = vadd.f32 %v931_v1, %v889_v14 }
 0x8fc   : > { %v1303_v16 = vpop.f32.mrf.mxu0 }
 0x8fd   : > { %1369 = vtanh.f32 %v937_v15  ;;  %v988_v17 = vmul.f32 0.5, %v937_v15 }
 0x8fe   : > { %v934_v18 = vpop.f32.mrf.mxu0 }
 0x900   : > { %v1304_v20 = vpop.f32.mrf.mxu0  ;;  %v981_v4 = vpop.f32.mrf.mxu1 }
 0x901   : > { %v987_v21 = vadd.f32 %v981_v4, %v939_v6 }
 0x902   : > { %v1311_v22 = vpop.f32.mrf.mxu1 }
 0x903   : > { %1371 = vtanh.f32 %v987_v21  ;;  %v1010_v2 = vmul.f32 0.5, %v987_v21 }
 0x904   : > { %v984_v3 = vpop.f32.mrf.mxu1  ;;  %1373 = vtanh.f32 %v988_v17 }
 0x905   : > { %1375 = vtanh.f32 %v1010_v2 }
 0x906   : > { %v1312_v23 = vpop.f32.mrf.mxu1 }
 0x90a   : > { %v1370_v24 = vpop.eup %1369 }
 0x90b   : > { %995 = vrot.lane.b32.xlu0 %v1370_v24, %s1394_s9 }
 0x910   : > { %v1372_v25 = vpop.eup %1371 }
 0x911   : > { %1017 = vrot.lane.b32.xlu1 %v1372_v25, %s1394_s9  ;;  %v1374_v26 = vpop.eup %1373 }
 0x912   : > { %v990_v19 = vadd.f32 1.0, %v1374_v26  ;;  %v1376_v5 = vpop.eup %1375 }
 0x913   : > { %v1012_v30 = vadd.f32 1.0, %v1376_v5 }
 0x914   : > { %v991_v27 = vmul.f32 0.5, %v990_v19 }
 0x915   : > { %v1013_v31 = vmul.f32 0.5, %v1012_v30 }
 0x916   : > { %v993_v35 = vmul.f32 %v991_v27, %v870_v34 }
 0x917   : > { %v1015_v40 = vmul.f32 %v1013_v31, %v872_v38 }
 0x97d   : > { %v996_v28 = vpop.permute.xlu0 %995 }
 0x97e   : > { %v998_v29 = vmul.f32 %v996_v28, %v991_v27 }
 0x980   : > { %1000 = vrot.lane.b32.xlu0 %v998_v29, %s1392_s29 }
 0x983   : > { %v1018_v32 = vpop.permute.xlu1 %1017 }
 0x984   : > { %v1020_v33 = vmul.f32 %v1018_v32, %v1013_v31 }
 0x986   : > { %1022 = vrot.lane.b32.xlu1 %v1020_v33, %s1392_s29 }
 0x9f2   : > { %v1001_v36 = vpop.permute.xlu0 %1000 }
 0x9f3   : > { %v1003_v37 = vadd.f32 %v1001_v36, %v993_v35 }
 0x9f5   : > { %1377 = vtanh.f32 %v1003_v37  ;;  %v1038_v58 = vsel %vm1034_vm10, %v1003_v37, %v870_v34 }
 0x9f8   : > { %v1023_v44 = vpop.permute.xlu1 %1022 }
 0x9f9   : > { %v1025_v45 = vadd.f32 %v1023_v44, %v1015_v40 }
 0x9fb   : > { %1379 = vtanh.f32 %v1025_v45  ;;  %v1040_v39 = vsel %vm1774_vm9, %v1025_v45, %v872_v38 }
 0xa02   : > { %v1378_v42 = vpop.eup %1377 }
 0xa03   : > { %1006 = vrot.lane.b32.xlu0 %v1378_v42, %s1394_s9 }
 0xa07   : > { %535 = vrot.lane.b32.xlu0 %v533_v43, %s1392_s29 }
 0xa08   : > { %v1380_v46 = vpop.eup %1379 }
 0xa09   : > { %1028 = vrot.lane.b32.xlu1 %v1380_v46, %s1394_s9 }
 0xa0b   : > { %705 = vrot.lane.b32.xlu0 %v703_v48, %s1392_s29 }
 0xa0d   : > { %542 = vrot.lane.b32.xlu1 %v540_v54, %s1392_s29 }
 0xa0f   : > { %875 = vrot.lane.b32.xlu0 %v873_v63, %s1392_s29 }
 0xa11   : > { %712 = vrot.lane.b32.xlu1 %v710_v0, %s1392_s29 }
 0xa15   : > { %882 = vrot.lane.b32.xlu1 %v880_v9, %s1392_s29 }
 0xa19   : > { %1060 = vrot.lane.b32.xlu1 %v1038_v58, %s1395_s13 }
 0xa75   : > { %v1007_v61 = vpop.permute.xlu0 %1006 }
 0xa76   : > { %v1009_v62 = vmul.f32 %v1007_v61, %v991_v27 }
 0xa78   : > { %v1041_v8 = vsel %vm1034_vm10, %v1009_v62, 0.0  ;;  %v1037_v53 = vsel %vm1034_vm10, %v1009_v62, %v1731_v52 }
 0xa79   : > { %1043 = vrot.lane.b32.xlu0 %v1041_v8, %s1392_s29  ;;  %v536_v50 = vpop.permute.xlu0 %535 }
 0xa7a   : > { %539 = vst.msk [vmem:[%s1460_s14] sm:$0xf] %vm538_vm11, %v536_v50 }
 0xa7b   : > { %v1029_v55 = vpop.permute.xlu1 %1028 }
 0xa7c   : > { %v1031_v49 = vmul.f32 %v1029_v55, %v1013_v31 }
 0xa7d   : > { %1055 = vrot.lane.b32.xlu0 %v1037_v53, %s1392_s29  ;;  %v706_v59 = vpop.permute.xlu0 %705 }
 0xa7e   : > { %1211 = vst.msk [vmem:[%s1460_s14 + $0x4] sm:$0xf] %vm538_vm11, %v706_v59  ;;  %v1048_v57 = vsel %vm1774_vm9, %v1031_v49, 0.0  ;;  %v1039_v56 = vsel %vm1774_vm9, %v1031_v49, %v1747_v51 }
 0xa7f   : > { %v543_v60 = vpop.permute.xlu1 %542  ;;  %1050 = vrot.lane.b32.xlu1 %v1048_v57, %s1392_s29 }
 0xa80   : > { %1206 = vst.msk [vmem:[%s1465_s17 + $0xc] sm:$0xf] %vm538_vm11, %v543_v60 }
 0xa81   : > { %1065 = vrot.lane.b32.xlu0 %v1039_v56, %s1392_s29  ;;  %v876_v52 = vpop.permute.xlu0 %875 }
 0xa82   : > { %1217 = vst.msk [vmem:[%s1460_s14 + $0x8] sm:$0xf] %vm538_vm11, %v876_v52 }
 0xa83   : > { %v713_v7 = vpop.permute.xlu1 %712  ;;  %1070 = vrot.lane.b32.xlu1 %v1040_v39, %s1395_s13 }
 0xa84   : > { %1212 = vst.msk [vmem:[%s1465_s17 + $0x8] sm:$0xf] %vm538_vm11, %v713_v7 }
 0xa87   : > { %v883_v11 = vpop.permute.xlu1 %882 }
 0xa88   : > { %1218 = vst.msk [vmem:[%s1465_s17 + $0x4] sm:$0xf] %vm538_vm11, %v883_v11 }
 0xa8b   : > { %v1061_v13 = vpop.permute.xlu1 %1060 }
 0xa8c   : > { %1063 = vst.msk [vmem:[#allocation3] sm:$0xf] %vm538_vm11, %v1061_v13 }
 0xaeb   : > { %v1044_v14 = vpop.permute.xlu0 %1043 }
 0xaec   : > { %1222 = vst.msk [vmem:[%s1460_s14 + $0xc] sm:$0xf] %vm538_vm11, %v1044_v14 }
 0xaef   : > { %v1056_v51 = vpop.permute.xlu0 %1055 }
 0xaf0   : > { %1058 = vst.msk [vmem:[#allocation2] sm:$0xf] %vm538_vm11, %v1056_v51 }
 0xaf1   : > { %v1051_v1 = vpop.permute.xlu1 %1050 }
 0xaf2   : > { %1053 = vst.msk [vmem:[%s1465_s17] sm:$0xf] %vm538_vm11, %v1051_v1 }
 0xaf3   : > { %v1066_v12 = vpop.permute.xlu0 %1065 }
 0xaf4   : > { %1068 = vst.msk [vmem:[#allocation2 + $0x4] sm:$0xf] %vm538_vm11, %v1066_v12 }
 0xaf5   : > { %v1071_v15 = vpop.permute.xlu1 %1070 }
 0xaf6   : > { %1073 = vst.msk [vmem:[#allocation3 + $0x4] sm:$0xf] %vm538_vm11, %v1071_v15 }
 0xaf7 PF: > { %s17_s21 = sadd.s32 1, %s1387_s21  }
 0xaf8   : > { %p14_p6 = scmp.ge.s32.totalorder %s17_s21, 5  }
 0xafa   :  { %16 = sbr.rel (!%p14_p6) target bundleno = 1 (0x1), region = 104 }

</bundles_post_ra>
